<compile_context>
chip_gen: v7x
topology: tpu7x:2x2x1
jax: 0.10.0
libtpu: 0.0.40
codegen_flags: <defaults>
</compile_context>

<pallas_src>
import functools

import jax
import jax.numpy as jnp
from jax.experimental import pallas as pl
from jax.experimental.pallas import tpu as pltpu


def _layernorm(x, gamma, beta, eps=1e-6):
    mu = jnp.mean(x, axis=-1, keepdims=True)
    var = jnp.mean((x - mu) ** 2, axis=-1, keepdims=True)
    return (x - mu) * jax.lax.rsqrt(var + eps) * gamma + beta


def _make_kernel(n_head, d_k, d_v, ff_chunk, return_attn):
    def kernel(xf_ref,
               wq_ref, wk_ref, wv_ref, wo_ref,
               ln1_g_ref, ln1_b_ref,
               w1_ref, b1_ref, w2_ref, b2_ref,
               ln2_g_ref, ln2_b_ref,
               out_ref, *rest):
        if return_attn:
            attn_ref, k_scratch, v_scratch = rest
        else:
            k_scratch, v_scratch = rest

        f32, bf16 = jnp.float32, jnp.bfloat16
        seq, d_model = xf_ref.shape[1], xf_ref.shape[2]
        tq = out_ref.shape[1]
        d_ff = w1_ref.shape[1]
        t = pl.program_id(1)

        # ---- K/V projections: once per batch element, reused across query tiles ----
        @pl.when(t == 0)
        def _():
            xf = xf_ref[0]                                                   # (L, D) bf16
            k = jnp.dot(xf, wk_ref[...], preferred_element_type=f32)        # (L, H*d_k)
            v = jnp.dot(xf, wv_ref[...], preferred_element_type=f32)        # (L, H*d_v)
            k_scratch[...] = k.astype(bf16).reshape(seq, n_head, d_k).transpose(1, 0, 2)
            v_scratch[...] = v.astype(bf16).reshape(seq, n_head, d_v).transpose(1, 0, 2)

        # ---- query tile sliced from the already-resident full-sequence block ----
        start = pl.multiple_of(t * tq, tq)
        xq = xf_ref[0, pl.ds(start, tq), :]                                  # (TQ, D) bf16
        xq_f32 = xq.astype(f32)                                              # residual path

        # ---- multi-head attention (packed projection, head-batched score/ctx) ----
        scale = 1.0 / (d_k ** 0.5)
        q = jnp.dot(xq, wq_ref[...], preferred_element_type=f32) * scale    # (TQ, H*d_k)
        q3 = q.astype(bf16).reshape(tq, n_head, d_k)                         # (TQ, H, d_k)

        # TODO(synk): pad_mask (masked_fill with -1e9) not wired in; this covers mask=None.
        s = jnp.einsum("qhe,hke->hqk", q3, k_scratch[...],
                       preferred_element_type=f32)                           # (H, TQ, L)
        p = jnp.exp(s - jnp.max(s, axis=-1, keepdims=True))
        p = p / jnp.sum(p, axis=-1, keepdims=True)                           # exact: attn is returned
        if return_attn:
            attn_ref[0] = p.astype(attn_ref.dtype)

        ctx = jnp.einsum("hqk,hkv->qhv", p.astype(bf16), v_scratch[...],
                         preferred_element_type=f32)                         # (TQ, H, d_v)
        y = jnp.dot(ctx.reshape(tq, n_head * d_v).astype(bf16), wo_ref[...],
                    preferred_element_type=f32)                              # (TQ, D)
        y = _layernorm(y + xq_f32, ln1_g_ref[...], ln1_b_ref[...])

        # ---- position-wise feed forward, chunked over d_ff ----
        y_bf = y.astype(bf16)
        h2 = jnp.zeros((tq, d_model), f32)
        for c in range(0, d_ff, ff_chunk):
            h1 = jnp.dot(y_bf, w1_ref[:, c:c + ff_chunk],
                         preferred_element_type=f32) + b1_ref[:, c:c + ff_chunk]
            h1 = jnp.maximum(h1, 0.0)
            h2 = h2 + jnp.dot(h1.astype(bf16), w2_ref[c:c + ff_chunk, :],
                              preferred_element_type=f32)
        h2 = h2 + b2_ref[...]
        z = _layernorm(h2 + y, ln2_g_ref[...], ln2_b_ref[...])
        out_ref[0] = z.astype(out_ref.dtype)

    return kernel


def encoder_layer(x, params, *, n_head, d_k, d_v, q_tile=None, return_attn=True):
    B, L, D = x.shape
    d_ff = params["w1"].shape[1]
    bf16 = jnp.bfloat16

    # Generation-aware VMEM budget (v7x: 64 MiB/TC; v5e/v6e: 128 MiB).
    try:
        vmem_cap = int(getattr(pltpu.get_tpu_info(), "vmem_capacity_bytes", 128 * 2 ** 20))
    except Exception:
        vmem_cap = 128 * 2 ** 20

    if q_tile is None:
        q_tile = 256 if vmem_cap >= 96 * 2 ** 20 else 128
    TQ = L if L <= q_tile else q_tile
    if L % TQ:
        raise ValueError("sequence length must be divisible by the query tile")
    NQ = L // TQ

    # FFN chunk bounds the live (TQ, chunk) f32 intermediate.
    ff_chunk = d_ff
    for c in (2048, 1024, 512):
        if d_ff > c and d_ff % c == 0:
            ff_chunk = c
            break

    # Packed projection weights, cast to bf16 once in the wrapper.
    wq = params["wq"].astype(bf16)            # (D, H*d_k)
    wk = params["wk"].astype(bf16)            # (D, H*d_k)
    wv = params["wv"].astype(bf16)            # (D, H*d_v)
    wo = params["wo"].astype(bf16)            # (H*d_v, D)
    w1 = params["w1"].astype(bf16)            # (D, d_ff)
    w2 = params["w2"].astype(bf16)            # (d_ff, D)
    x_bf = x.astype(bf16)

    def vmem():  # grid-invariant operand: whole array resident in VMEM (single-buffered)
        return pl.BlockSpec(memory_space=pltpu.MemorySpace.VMEM)

    out_specs = [pl.BlockSpec((1, TQ, D), lambda b, t: (b, t, 0))]
    out_shape = [jax.ShapeDtypeStruct((B, L, D), jnp.float32)]
    if return_attn:
        out_specs.append(pl.BlockSpec((1, n_head, TQ, L), lambda b, t: (b, 0, t, 0)))
        out_shape.append(jax.ShapeDtypeStruct((B, n_head, L, L), jnp.bfloat16))

    grid_spec = pltpu.PrefetchScalarGridSpec(
        num_scalar_prefetch=0,
        grid=(B, NQ),
        in_specs=[
            pl.BlockSpec((1, L, D), lambda b, t: (b, 0, 0)),   # full sequence (bf16), q tile sliced in-kernel
            vmem(), vmem(), vmem(), vmem(),                    # wq, wk, wv, wo
            vmem(), vmem(),                                    # ln1 gamma / beta
            vmem(), vmem(), vmem(), vmem(),                    # w1, b1, w2, b2
            vmem(), vmem(),                                    # ln2 gamma / beta
        ],
        out_specs=tuple(out_specs) if return_attn else out_specs[0],
        scratch_shapes=[
            pltpu.VMEM((n_head, L, d_k), bf16),                # cached K (head-major), reused over t
            pltpu.VMEM((n_head, L, d_v), bf16),                # cached V (head-major), reused over t
        ],
    )

    # VMEM budget estimate (weights + double-buffered blocks + K/V scratch + live intermediates).
    weight_bytes = sum(int(a.size) * a.dtype.itemsize for a in (wq, wk, wv, wo, w1, w2))
    weight_bytes += sum(int(params[k].size) * 4
                        for k in ("b1", "b2", "ln1_g", "ln1_b", "ln2_g", "ln2_b"))
    kv_bytes = 2 * n_head * L * (d_k + d_v)                       # bf16 scratch
    block_bytes = 2 * (L * D * 2) + 2 * (TQ * D * 4)              # xf (bf16) + out (f32), double-buffered
    if return_attn:
        block_bytes += 2 * (n_head * TQ * L * 2)                  # attn out (bf16), double-buffered
    interm_bytes = 4 * (3 * n_head * TQ * L                       # s / p / ctx-epilogue
                        + TQ * (2 * D + n_head * (d_k + d_v))
                        + 2 * TQ * ff_chunk)
    need = weight_bytes + kv_bytes + block_bytes + interm_bytes
    vmem_limit = int(min(int(0.75 * vmem_cap), max(32 * 2 ** 20, int(1.25 * need))))

    kernel = _make_kernel(n_head, d_k, d_v, ff_chunk, return_attn)
    result = pl.pallas_call(
        kernel,
        grid_spec=grid_spec,
        out_shape=tuple(out_shape) if return_attn else out_shape[0],
        compiler_params=pltpu.CompilerParams(
            # batch "parallel" (sharded across v7x's 2 TCs); query-tile axis "arbitrary"
            # so the t==0 K/V-cache fill is ordered before its consumers.
            dimension_semantics=("parallel", "arbitrary"),
            vmem_limit_bytes=vmem_limit,
        ),
    )(x_bf, wq, wk, wv, wo,
      params["ln1_g"], params["ln1_b"],
      w1, params["b1"], w2, params["b2"],
      params["ln2_g"], params["ln2_b"])
    return result


def encoder_layer_ref(x, p, *, n_head, d_k, d_v):
    """Pure-JAX f32 reference mirroring the PyTorch forward (eval mode, mask=None)."""
    B, L, D = x.shape
    q = (x @ p["wq"]).reshape(B, L, n_head, d_k).transpose(0, 2, 1, 3)
    k = (x @ p["wk"]).reshape(B, L, n_head, d_k).transpose(0, 2, 1, 3)
    v = (x @ p["wv"]).reshape(B, L, n_head, d_v).transpose(0, 2, 1, 3)
    s = jnp.einsum("bhqd,bhkd->bhqk", q, k) / (d_k ** 0.5)
    attn = jax.nn.softmax(s, axis=-1)
    o = jnp.einsum("bhqk,bhkd->bhqd", attn, v).transpose(0, 2, 1, 3).reshape(B, L, -1)
    y = o @ p["wo"] + x
    mu = y.mean(-1, keepdims=True); var = ((y - mu) ** 2).mean(-1, keepdims=True)
    y = (y - mu) / jnp.sqrt(var + 1e-6) * p["ln1_g"] + p["ln1_b"]
    h = jnp.maximum(y @ p["w1"] + p["b1"], 0.0)
    z = h @ p["w2"] + p["b2"] + y
    mu = z.mean(-1, keepdims=True); var = ((z - mu) ** 2).mean(-1, keepdims=True)
    z = (z - mu) / jnp.sqrt(var + 1e-6) * p["ln2_g"] + p["ln2_b"]
    return z, attn


if __name__ == "__main__":
    B, L = 2, 8
    d_model, d_ff = 32, 64
    n_head, d_k, d_v = 4, 8, 8

    key = jax.random.PRNGKey(0)
    ks = jax.random.split(key, 9)

    params = {
        "wq": 0.05 * jax.random.normal(ks[0], (d_model, n_head * d_k), jnp.float32),
        "wk": 0.05 * jax.random.normal(ks[1], (d_model, n_head * d_k), jnp.float32),
        "wv": 0.05 * jax.random.normal(ks[2], (d_model, n_head * d_v), jnp.float32),
        "wo": 0.05 * jax.random.normal(ks[3], (n_head * d_v, d_model), jnp.float32),
        "ln1_g": jnp.ones((1, d_model), jnp.float32),
        "ln1_b": jnp.zeros((1, d_model), jnp.float32),
        "w1": 0.05 * jax.random.normal(ks[4], (d_model, d_ff), jnp.float32),
        "b1": 0.01 * jax.random.normal(ks[5], (1, d_ff), jnp.float32),
        "w2": 0.05 * jax.random.normal(ks[6], (d_ff, d_model), jnp.float32),
        "b2": 0.01 * jax.random.normal(ks[7], (1, d_model), jnp.float32),
        "ln2_g": jnp.ones((1, d_model), jnp.float32),
        "ln2_b": jnp.zeros((1, d_model), jnp.float32),
    }

    x = jax.random.normal(ks[8], (B, L, d_model), jnp.float32)

    out, attn = encoder_layer(x, params, n_head=n_head, d_k=d_k, d_v=d_v, return_attn=True)
    out = jax.block_until_ready(out)
    attn = jax.block_until_ready(attn)

    ref_out, ref_attn = encoder_layer_ref(x, params, n_head=n_head, d_k=d_k, d_v=d_v)
    # bf16 inputs/matmuls with f32 accumulation vs an all-f32 reference -> loosened tolerances.
    assert jnp.allclose(out, ref_out, atol=5e-2, rtol=5e-2), \
        float(jnp.max(jnp.abs(out - ref_out)))
    assert jnp.allclose(attn.astype(jnp.float32), ref_attn, atol=2e-2, rtol=2e-2), \
        float(jnp.max(jnp.abs(attn.astype(jnp.float32) - ref_attn)))

    print("KERNEL_OK")
</pallas_src>

<mosaic_0001>
module attributes {stable_mosaic.version = 11 : i64} {
  func.func @kernel(%arg0: i32, %arg1: i32, %arg2: memref<1x8x32xbf16, #tpu.memory_space<vmem>>, %arg3: memref<32x32xbf16, #tpu.memory_space<vmem>>, %arg4: memref<32x32xbf16, #tpu.memory_space<vmem>>, %arg5: memref<32x32xbf16, #tpu.memory_space<vmem>>, %arg6: memref<32x32xbf16, #tpu.memory_space<vmem>>, %arg7: memref<1x32xf32, #tpu.memory_space<vmem>>, %arg8: memref<1x32xf32, #tpu.memory_space<vmem>>, %arg9: memref<32x64xbf16, #tpu.memory_space<vmem>>, %arg10: memref<1x64xf32, #tpu.memory_space<vmem>>, %arg11: memref<64x32xbf16, #tpu.memory_space<vmem>>, %arg12: memref<1x32xf32, #tpu.memory_space<vmem>>, %arg13: memref<1x32xf32, #tpu.memory_space<vmem>>, %arg14: memref<1x32xf32, #tpu.memory_space<vmem>>, %arg15: memref<1x8x32xf32, #tpu.memory_space<vmem>>, %arg16: memref<1x4x8x8xbf16, #tpu.memory_space<vmem>>, %arg17: memref<4x8x8xbf16, #tpu.memory_space<vmem>>, %arg18: memref<4x8x8xbf16, #tpu.memory_space<vmem>>) attributes {dimension_semantics = [#tpu.dimension_semantics<parallel>, #tpu.dimension_semantics<arbitrary>], iteration_bounds = array<i64: 2, 1>, scalar_prefetch = 0 : i64, scratch_operands = 2 : i64, tpu.core_type = #tpu.core_type<tc>, window_params = [{transform_indices = @transform_0, window_bounds = array<i64: 1, 8, 32>}, {pipeline_mode = #tpu.pipeline_mode<synchronous>, transform_indices = @transform_1, window_bounds = array<i64: 32, 32>}, {pipeline_mode = #tpu.pipeline_mode<synchronous>, transform_indices = @transform_2, window_bounds = array<i64: 32, 32>}, {pipeline_mode = #tpu.pipeline_mode<synchronous>, transform_indices = @transform_3, window_bounds = array<i64: 32, 32>}, {pipeline_mode = #tpu.pipeline_mode<synchronous>, transform_indices = @transform_4, window_bounds = array<i64: 32, 32>}, {pipeline_mode = #tpu.pipeline_mode<synchronous>, transform_indices = @transform_5, window_bounds = array<i64: 1, 32>}, {pipeline_mode = #tpu.pipeline_mode<synchronous>, transform_indices = @transform_6, window_bounds = array<i64: 1, 32>}, {pipeline_mode = #tpu.pipeline_mode<synchronous>, transform_indices = @transform_7, window_bounds = array<i64: 32, 64>}, {pipeline_mode = #tpu.pipeline_mode<synchronous>, transform_indices = @transform_8, window_bounds = array<i64: 1, 64>}, {pipeline_mode = #tpu.pipeline_mode<synchronous>, transform_indices = @transform_9, window_bounds = array<i64: 64, 32>}, {pipeline_mode = #tpu.pipeline_mode<synchronous>, transform_indices = @transform_10, window_bounds = array<i64: 1, 32>}, {pipeline_mode = #tpu.pipeline_mode<synchronous>, transform_indices = @transform_11, window_bounds = array<i64: 1, 32>}, {pipeline_mode = #tpu.pipeline_mode<synchronous>, transform_indices = @transform_12, window_bounds = array<i64: 1, 32>}, {transform_indices = @transform_13, window_bounds = array<i64: 1, 8, 32>}, {transform_indices = @transform_14, window_bounds = array<i64: 1, 4, 8, 8>}]} {
    %c0_i32 = arith.constant 0 : i32
    %0 = arith.cmpi eq, %arg1, %c0_i32 : i32
    %1 = arith.extui %0 : i1 to i32
    %c0_i32_0 = arith.constant 0 : i32
    %2 = arith.cmpi ne, %1, %c0_i32_0 : i32
    scf.if %2 {
      %c0_55 = arith.constant 0 : index
      %c0_56 = arith.constant 0 : index
      %c0_57 = arith.constant 0 : index
      %107 = vector.load %arg2[%c0_55, %c0_56, %c0_57] : memref<1x8x32xbf16, #tpu.memory_space<vmem>>, vector<1x8x32xbf16>
      %108 = vector.shape_cast %107 : vector<1x8x32xbf16> to vector<8x32xbf16>
      %c0_58 = arith.constant 0 : index
      %c0_59 = arith.constant 0 : index
      %109 = vector.load %arg4[%c0_58, %c0_59] : memref<32x32xbf16, #tpu.memory_space<vmem>>, vector<32x32xbf16>
      %cst_60 = arith.constant dense<0.000000e+00> : vector<8x32xf32>
      %110 = tpu.matmul %108, %109, %cst_60 {dimension_numbers = #tpu.dot_dimension_numbers<[1], [0], [0], [1], [0, 0, 1, 1], [], []>} : vector<8x32xbf16>, vector<32x32xbf16>, vector<8x32xf32> -> vector<8x32xf32>
      %c0_61 = arith.constant 0 : index
      %c0_62 = arith.constant 0 : index
      %111 = vector.load %arg5[%c0_61, %c0_62] : memref<32x32xbf16, #tpu.memory_space<vmem>>, vector<32x32xbf16>
      %cst_63 = arith.constant dense<0.000000e+00> : vector<8x32xf32>
      %112 = tpu.matmul %108, %111, %cst_63 {dimension_numbers = #tpu.dot_dimension_numbers<[1], [0], [0], [1], [0, 0, 1, 1], [], []>} : vector<8x32xbf16>, vector<32x32xbf16>, vector<8x32xf32> -> vector<8x32xf32>
      %113 = arith.truncf %110 : vector<8x32xf32> to vector<8x32xbf16>
      %114 = vector.shape_cast %113 : vector<8x32xbf16> to vector<8x4x8xbf16>
      %115 = tpu.transpose %114, [1, 0, 2] : vector<8x4x8xbf16> -> vector<4x8x8xbf16>
      %c0_64 = arith.constant 0 : index
      %c0_65 = arith.constant 0 : index
      %c0_66 = arith.constant 0 : index
      %116 = vector.load %arg17[%c0_64, %c0_65, %c0_66] : memref<4x8x8xbf16, #tpu.memory_space<vmem>>, vector<4x8x8xbf16>
      tpu.vector_store %arg17[%c0_64, %c0_65, %c0_66], %115 {strides = array<i32>} : memref<4x8x8xbf16, #tpu.memory_space<vmem>>, vector<4x8x8xbf16>,
      %117 = arith.truncf %112 : vector<8x32xf32> to vector<8x32xbf16>
      %118 = vector.shape_cast %117 : vector<8x32xbf16> to vector<8x4x8xbf16>
      %119 = tpu.transpose %118, [1, 0, 2] : vector<8x4x8xbf16> -> vector<4x8x8xbf16>
      %c0_67 = arith.constant 0 : index
      %c0_68 = arith.constant 0 : index
      %c0_69 = arith.constant 0 : index
      %120 = vector.load %arg18[%c0_67, %c0_68, %c0_69] : memref<4x8x8xbf16, #tpu.memory_space<vmem>>, vector<4x8x8xbf16>
      tpu.vector_store %arg18[%c0_67, %c0_68, %c0_69], %119 {strides = array<i32>} : memref<4x8x8xbf16, #tpu.memory_space<vmem>>, vector<4x8x8xbf16>,
    } else {
    }
    %c8_i32 = arith.constant 8 : i32
    %3 = arith.muli %arg1, %c8_i32 : i32
    %4 = tpu.assume_multiple %3, 8 : i32
    %c0 = arith.constant 0 : index
    %5 = arith.index_cast %4 : i32 to index
    %c0_1 = arith.constant 0 : index
    %6 = vector.load %arg2[%c0, %5, %c0_1] : memref<1x8x32xbf16, #tpu.memory_space<vmem>>, vector<1x8x32xbf16>
    %7 = vector.shape_cast %6 : vector<1x8x32xbf16> to vector<8x32xbf16>
    %8 = arith.extf %7 : vector<8x32xbf16> to vector<8x32xf32>
    %c0_2 = arith.constant 0 : index
    %c0_3 = arith.constant 0 : index
    %9 = vector.load %arg3[%c0_2, %c0_3] : memref<32x32xbf16, #tpu.memory_space<vmem>>, vector<32x32xbf16>
    %cst = arith.constant dense<0.000000e+00> : vector<8x32xf32>
    %10 = tpu.matmul %7, %9, %cst {dimension_numbers = #tpu.dot_dimension_numbers<[1], [0], [0], [1], [0, 0, 1, 1], [], []>} : vector<8x32xbf16>, vector<32x32xbf16>, vector<8x32xf32> -> vector<8x32xf32>
    %cst_4 = arith.constant 0.353553385 : f32
    %11 = vector.broadcast %cst_4 : f32 to vector<8x32xf32>
    %12 = arith.mulf %10, %11 : vector<8x32xf32>
    %13 = arith.truncf %12 : vector<8x32xf32> to vector<8x32xbf16>
    %14 = vector.shape_cast %13 : vector<8x32xbf16> to vector<8x4x8xbf16>
    %c0_5 = arith.constant 0 : index
    %c0_6 = arith.constant 0 : index
    %c0_7 = arith.constant 0 : index
    %15 = vector.load %arg17[%c0_5, %c0_6, %c0_7] : memref<4x8x8xbf16, #tpu.memory_space<vmem>>, vector<4x8x8xbf16>
    "tpu.trace_start"() <{level = 10 : i32, message = "qhe,hke->hqk"}> : () -> ()
    %cst_8 = arith.constant dense<0.000000e+00> : vector<4x8x8xf32>
    %16 = tpu.matmul %14, %15, %cst_8 {dimension_numbers = #tpu.dot_dimension_numbers<[2], [2], [0], [1], [0, 1, 0, 0, 1, 1], [1], [0]>} : vector<8x4x8xbf16>, vector<4x8x8xbf16>, vector<4x8x8xf32> -> vector<4x8x8xf32>
    "tpu.trace_stop"() : () -> ()
    %cst_9 = arith.constant dense<0xFF800000> : vector<4x8xf32>
    %17 = vector.multi_reduction <maximumf>, %16, %cst_9 [2] : vector<4x8x8xf32> to vector<4x8xf32>
    %18 = vector.shape_cast %17 : vector<4x8xf32> to vector<4x8x1xf32>
    %19 = vector.broadcast %18 : vector<4x8x1xf32> to vector<4x8x8xf32>
    %20 = arith.subf %16, %19 : vector<4x8x8xf32>
    %21 = math.exp %20 : vector<4x8x8xf32>
    %cst_10 = arith.constant dense<0.000000e+00> : vector<4x8xf32>
    %22 = vector.multi_reduction <add>, %21, %cst_10 [2] : vector<4x8x8xf32> to vector<4x8xf32>
    %23 = vector.shape_cast %22 : vector<4x8xf32> to vector<4x8x1xf32>
    %24 = vector.broadcast %23 : vector<4x8x1xf32> to vector<4x8x8xf32>
    %25 = arith.divf %21, %24 : vector<4x8x8xf32>
    %26 = arith.truncf %25 : vector<4x8x8xf32> to vector<4x8x8xbf16>
    %c0_11 = arith.constant 0 : index
    %c0_12 = arith.constant 0 : index
    %c0_13 = arith.constant 0 : index
    %c0_14 = arith.constant 0 : index
    %27 = vector.load %arg16[%c0_11, %c0_12, %c0_13, %c0_14] : memref<1x4x8x8xbf16, #tpu.memory_space<vmem>>, vector<1x4x8x8xbf16>
    %28 = vector.shape_cast %27 : vector<1x4x8x8xbf16> to vector<4x8x8xbf16>
    %29 = vector.shape_cast %26 : vector<4x8x8xbf16> to vector<1x4x8x8xbf16>
    tpu.vector_store %arg16[%c0_11, %c0_12, %c0_13, %c0_14], %29 {strides = array<i32>} : memref<1x4x8x8xbf16, #tpu.memory_space<vmem>>, vector<1x4x8x8xbf16>,
    %30 = arith.truncf %25 : vector<4x8x8xf32> to vector<4x8x8xbf16>
    %c0_15 = arith.constant 0 : index
    %c0_16 = arith.constant 0 : index
    %c0_17 = arith.constant 0 : index
    %31 = vector.load %arg18[%c0_15, %c0_16, %c0_17] : memref<4x8x8xbf16, #tpu.memory_space<vmem>>, vector<4x8x8xbf16>
    "tpu.trace_start"() <{level = 10 : i32, message = "hqk,hkv->qhv"}> : () -> ()
    %cst_18 = arith.constant dense<0.000000e+00> : vector<4x8x8xf32>
    %32 = tpu.matmul %31, %30, %cst_18 {dimension_numbers = #tpu.dot_dimension_numbers<[1], [2], [2], [1], [0, 0, 0, 2, 1, 1], [0], [0]>} : vector<4x8x8xbf16>, vector<4x8x8xbf16>, vector<4x8x8xf32> -> vector<4x8x8xf32>
    %33 = tpu.transpose %32, [2, 0, 1] : vector<4x8x8xf32> -> vector<8x4x8xf32>
    "tpu.trace_stop"() : () -> ()
    %34 = vector.shape_cast %33 : vector<8x4x8xf32> to vector<8x32xf32>
    %35 = arith.truncf %34 : vector<8x32xf32> to vector<8x32xbf16>
    %c0_19 = arith.constant 0 : index
    %c0_20 = arith.constant 0 : index
    %36 = vector.load %arg6[%c0_19, %c0_20] : memref<32x32xbf16, #tpu.memory_space<vmem>>, vector<32x32xbf16>
    %cst_21 = arith.constant dense<0.000000e+00> : vector<8x32xf32>
    %37 = tpu.matmul %35, %36, %cst_21 {dimension_numbers = #tpu.dot_dimension_numbers<[1], [0], [0], [1], [0, 0, 1, 1], [], []>} : vector<8x32xbf16>, vector<32x32xbf16>, vector<8x32xf32> -> vector<8x32xf32>
    %38 = arith.addf %37, %8 : vector<8x32xf32>
    %c0_22 = arith.constant 0 : index
    %c0_23 = arith.constant 0 : index
    %39 = vector.load %arg7[%c0_22, %c0_23] : memref<1x32xf32, #tpu.memory_space<vmem>>, vector<1x32xf32>
    %c0_24 = arith.constant 0 : index
    %c0_25 = arith.constant 0 : index
    %40 = vector.load %arg8[%c0_24, %c0_25] : memref<1x32xf32, #tpu.memory_space<vmem>>, vector<1x32xf32>
    %cst_26 = arith.constant dense<0.000000e+00> : vector<8xf32>
    %41 = vector.multi_reduction <add>, %38, %cst_26 [1] : vector<8x32xf32> to vector<8xf32>
    %42 = vector.shape_cast %41 : vector<8xf32> to vector<8x1xf32>
    %cst_27 = arith.constant 3.200000e+01 : f32
    %43 = vector.broadcast %cst_27 : f32 to vector<8x1xf32>
    %44 = arith.divf %42, %43 : vector<8x1xf32>
    %45 = vector.broadcast %44 : vector<8x1xf32> to vector<8x32xf32>
    %46 = arith.subf %38, %45 : vector<8x32xf32>
    %47 = arith.mulf %46, %46 : vector<8x32xf32>
    %cst_28 = arith.constant dense<0.000000e+00> : vector<8xf32>
    %48 = vector.multi_reduction <add>, %47, %cst_28 [1] : vector<8x32xf32> to vector<8xf32>
    %49 = vector.shape_cast %48 : vector<8xf32> to vector<8x1xf32>
    %cst_29 = arith.constant 3.200000e+01 : f32
    %50 = vector.broadcast %cst_29 : f32 to vector<8x1xf32>
    %51 = arith.divf %49, %50 : vector<8x1xf32>
    %52 = vector.broadcast %44 : vector<8x1xf32> to vector<8x32xf32>
    %53 = arith.subf %38, %52 : vector<8x32xf32>
    %cst_30 = arith.constant 9.99999997E-7 : f32
    %54 = vector.broadcast %cst_30 : f32 to vector<8x1xf32>
    %55 = arith.addf %51, %54 : vector<8x1xf32>
    %56 = math.rsqrt %55 : vector<8x1xf32>
    %57 = vector.broadcast %56 : vector<8x1xf32> to vector<8x32xf32>
    %58 = arith.mulf %53, %57 : vector<8x32xf32>
    %59 = vector.broadcast %39 : vector<1x32xf32> to vector<8x32xf32>
    %60 = arith.mulf %58, %59 : vector<8x32xf32>
    %61 = vector.broadcast %40 : vector<1x32xf32> to vector<8x32xf32>
    %62 = arith.addf %60, %61 : vector<8x32xf32>
    %63 = arith.truncf %62 : vector<8x32xf32> to vector<8x32xbf16>
    %cst_31 = arith.constant 0.000000e+00 : f32
    %64 = vector.broadcast %cst_31 : f32 to vector<8x32xf32>
    %c0_32 = arith.constant 0 : index
    %c0_33 = arith.constant 0 : index
    %65 = vector.load %arg9[%c0_32, %c0_33] : memref<32x64xbf16, #tpu.memory_space<vmem>>, vector<32x64xbf16>
    %cst_34 = arith.constant dense<0.000000e+00> : vector<8x64xf32>
    %66 = tpu.matmul %63, %65, %cst_34 {dimension_numbers = #tpu.dot_dimension_numbers<[1], [0], [0], [1], [0, 0, 1, 1], [], []>} : vector<8x32xbf16>, vector<32x64xbf16>, vector<8x64xf32> -> vector<8x64xf32>
    %c0_35 = arith.constant 0 : index
    %c0_36 = arith.constant 0 : index
    %67 = vector.load %arg10[%c0_35, %c0_36] : memref<1x64xf32, #tpu.memory_space<vmem>>, vector<1x64xf32>
    %68 = vector.broadcast %67 : vector<1x64xf32> to vector<8x64xf32>
    %69 = arith.addf %66, %68 : vector<8x64xf32>
    %cst_37 = arith.constant 0.000000e+00 : f32
    %70 = vector.broadcast %cst_37 : f32 to vector<8x64xf32>
    %71 = arith.maximumf %69, %70 : vector<8x64xf32>
    %72 = arith.truncf %71 : vector<8x64xf32> to vector<8x64xbf16>
    %c0_38 = arith.constant 0 : index
    %c0_39 = arith.constant 0 : index
    %73 = vector.load %arg11[%c0_38, %c0_39] : memref<64x32xbf16, #tpu.memory_space<vmem>>, vector<64x32xbf16>
    %cst_40 = arith.constant dense<0.000000e+00> : vector<8x32xf32>
    %74 = tpu.matmul %72, %73, %cst_40 {dimension_numbers = #tpu.dot_dimension_numbers<[1], [0], [0], [1], [0, 0, 1, 1], [], []>} : vector<8x64xbf16>, vector<64x32xbf16>, vector<8x32xf32> -> vector<8x32xf32>
    %75 = arith.addf %64, %74 : vector<8x32xf32>
    %c0_41 = arith.constant 0 : index
    %c0_42 = arith.constant 0 : index
    %76 = vector.load %arg12[%c0_41, %c0_42] : memref<1x32xf32, #tpu.memory_space<vmem>>, vector<1x32xf32>
    %77 = vector.broadcast %76 : vector<1x32xf32> to vector<8x32xf32>
    %78 = arith.addf %75, %77 : vector<8x32xf32>
    %79 = arith.addf %78, %62 : vector<8x32xf32>
    %c0_43 = arith.constant 0 : index
    %c0_44 = arith.constant 0 : index
    %80 = vector.load %arg13[%c0_43, %c0_44] : memref<1x32xf32, #tpu.memory_space<vmem>>, vector<1x32xf32>
    %c0_45 = arith.constant 0 : index
    %c0_46 = arith.constant 0 : index
    %81 = vector.load %arg14[%c0_45, %c0_46] : memref<1x32xf32, #tpu.memory_space<vmem>>, vector<1x32xf32>
    %cst_47 = arith.constant dense<0.000000e+00> : vector<8xf32>
    %82 = vector.multi_reduction <add>, %79, %cst_47 [1] : vector<8x32xf32> to vector<8xf32>
    %83 = vector.shape_cast %82 : vector<8xf32> to vector<8x1xf32>
    %cst_48 = arith.constant 3.200000e+01 : f32
    %84 = vector.broadcast %cst_48 : f32 to vector<8x1xf32>
    %85 = arith.divf %83, %84 : vector<8x1xf32>
    %86 = vector.broadcast %85 : vector<8x1xf32> to vector<8x32xf32>
    %87 = arith.subf %79, %86 : vector<8x32xf32>
    %88 = arith.mulf %87, %87 : vector<8x32xf32>
    %cst_49 = arith.constant dense<0.000000e+00> : vector<8xf32>
    %89 = vector.multi_reduction <add>, %88, %cst_49 [1] : vector<8x32xf32> to vector<8xf32>
    %90 = vector.shape_cast %89 : vector<8xf32> to vector<8x1xf32>
    %cst_50 = arith.constant 3.200000e+01 : f32
    %91 = vector.broadcast %cst_50 : f32 to vector<8x1xf32>
    %92 = arith.divf %90, %91 : vector<8x1xf32>
    %93 = vector.broadcast %85 : vector<8x1xf32> to vector<8x32xf32>
    %94 = arith.subf %79, %93 : vector<8x32xf32>
    %cst_51 = arith.constant 9.99999997E-7 : f32
    %95 = vector.broadcast %cst_51 : f32 to vector<8x1xf32>
    %96 = arith.addf %92, %95 : vector<8x1xf32>
    %97 = math.rsqrt %96 : vector<8x1xf32>
    %98 = vector.broadcast %97 : vector<8x1xf32> to vector<8x32xf32>
    %99 = arith.mulf %94, %98 : vector<8x32xf32>
    %100 = vector.broadcast %80 : vector<1x32xf32> to vector<8x32xf32>
    %101 = arith.mulf %99, %100 : vector<8x32xf32>
    %102 = vector.broadcast %81 : vector<1x32xf32> to vector<8x32xf32>
    %103 = arith.addf %101, %102 : vector<8x32xf32>
    %c0_52 = arith.constant 0 : index
    %c0_53 = arith.constant 0 : index
    %c0_54 = arith.constant 0 : index
    %104 = vector.load %arg15[%c0_52, %c0_53, %c0_54] : memref<1x8x32xf32, #tpu.memory_space<vmem>>, vector<1x8x32xf32>
    %105 = vector.shape_cast %104 : vector<1x8x32xf32> to vector<8x32xf32>
    %106 = vector.shape_cast %103 : vector<8x32xf32> to vector<1x8x32xf32>
    tpu.vector_store %arg15[%c0_52, %c0_53, %c0_54], %106 {strides = array<i32>} : memref<1x8x32xf32, #tpu.memory_space<vmem>>, vector<1x8x32xf32>,
    return
  }
  func.func @transform_0(%arg0: i32, %arg1: i32) -> (i32, i32, i32) {
    %c0_i32 = arith.constant 0 : i32
    %c0_i32_0 = arith.constant 0 : i32
    %c0_i32_1 = arith.constant 0 : i32
    return %arg0, %c0_i32, %c0_i32_0 : i32, i32, i32
  }
  func.func @transform_1(%arg0: i32, %arg1: i32) -> (i32, i32) {
    %c0_i32 = arith.constant 0 : i32
    %c0_i32_0 = arith.constant 0 : i32
    %c0_i32_1 = arith.constant 0 : i32
    return %c0_i32, %c0_i32_0 : i32, i32
  }
  func.func @transform_2(%arg0: i32, %arg1: i32) -> (i32, i32) {
    %c0_i32 = arith.constant 0 : i32
    %c0_i32_0 = arith.constant 0 : i32
    %c0_i32_1 = arith.constant 0 : i32
    return %c0_i32, %c0_i32_0 : i32, i32
  }
  func.func @transform_3(%arg0: i32, %arg1: i32) -> (i32, i32) {
    %c0_i32 = arith.constant 0 : i32
    %c0_i32_0 = arith.constant 0 : i32
    %c0_i32_1 = arith.constant 0 : i32
    return %c0_i32, %c0_i32_0 : i32, i32
  }
  func.func @transform_4(%arg0: i32, %arg1: i32) -> (i32, i32) {
    %c0_i32 = arith.constant 0 : i32
    %c0_i32_0 = arith.constant 0 : i32
    %c0_i32_1 = arith.constant 0 : i32
    return %c0_i32, %c0_i32_0 : i32, i32
  }
  func.func @transform_5(%arg0: i32, %arg1: i32) -> (i32, i32) {
    %c0_i32 = arith.constant 0 : i32
    %c0_i32_0 = arith.constant 0 : i32
    %c0_i32_1 = arith.constant 0 : i32
    return %c0_i32, %c0_i32_0 : i32, i32
  }
  func.func @transform_6(%arg0: i32, %arg1: i32) -> (i32, i32) {
    %c0_i32 = arith.constant 0 : i32
    %c0_i32_0 = arith.constant 0 : i32
    %c0_i32_1 = arith.constant 0 : i32
    return %c0_i32, %c0_i32_0 : i32, i32
  }
  func.func @transform_7(%arg0: i32, %arg1: i32) -> (i32, i32) {
    %c0_i32 = arith.constant 0 : i32
    %c0_i32_0 = arith.constant 0 : i32
    %c0_i32_1 = arith.constant 0 : i32
    return %c0_i32, %c0_i32_0 : i32, i32
  }
  func.func @transform_8(%arg0: i32, %arg1: i32) -> (i32, i32) {
    %c0_i32 = arith.constant 0 : i32
    %c0_i32_0 = arith.constant 0 : i32
    %c0_i32_1 = arith.constant 0 : i32
    return %c0_i32, %c0_i32_0 : i32, i32
  }
  func.func @transform_9(%arg0: i32, %arg1: i32) -> (i32, i32) {
    %c0_i32 = arith.constant 0 : i32
    %c0_i32_0 = arith.constant 0 : i32
    %c0_i32_1 = arith.constant 0 : i32
    return %c0_i32, %c0_i32_0 : i32, i32
  }
  func.func @transform_10(%arg0: i32, %arg1: i32) -> (i32, i32) {
    %c0_i32 = arith.constant 0 : i32
    %c0_i32_0 = arith.constant 0 : i32
    %c0_i32_1 = arith.constant 0 : i32
    return %c0_i32, %c0_i32_0 : i32, i32
  }
  func.func @transform_11(%arg0: i32, %arg1: i32) -> (i32, i32) {
    %c0_i32 = arith.constant 0 : i32
    %c0_i32_0 = arith.constant 0 : i32
    %c0_i32_1 = arith.constant 0 : i32
    return %c0_i32, %c0_i32_0 : i32, i32
  }
  func.func @transform_12(%arg0: i32, %arg1: i32) -> (i32, i32) {
    %c0_i32 = arith.constant 0 : i32
    %c0_i32_0 = arith.constant 0 : i32
    %c0_i32_1 = arith.constant 0 : i32
    return %c0_i32, %c0_i32_0 : i32, i32
  }
  func.func @transform_13(%arg0: i32, %arg1: i32) -> (i32, i32, i32) {
    %c0_i32 = arith.constant 0 : i32
    %c0_i32_0 = arith.constant 0 : i32
    return %arg0, %arg1, %c0_i32 : i32, i32, i32
  }
  func.func @transform_14(%arg0: i32, %arg1: i32) -> (i32, i32, i32, i32) {
    %c0_i32 = arith.constant 0 : i32
    %c0_i32_0 = arith.constant 0 : i32
    %c0_i32_1 = arith.constant 0 : i32
    return %arg0, %c0_i32, %arg1, %c0_i32_0 : i32, i32, i32, i32
  }
}

</mosaic_0001>

<bundles_post_ra>
// kernel: tpu_custom_call.1
= control target key start
LH: loop header
LB: loop body
LE: loop exit
PB: predicated region body
PF: predicated region fallthrough
CT: control target
= control target key end

     0   :  { %s3474_s0 = inlined_call_operand.hbm [shape: bf16[2,8,32], index: 0, kind: input, shape index: {}]   ;;  %s3475_s1 = inlined_call_operand.vmem [shape: bf16[32,32], index: 1, kind: input, shape index: {}]   ;;  %s3476_s2 = inlined_call_operand.vmem [shape: bf16[32,32], index: 2, kind: input, shape index: {}]   ;;  %s3477_s3 = inlined_call_operand.vmem [shape: bf16[32,32], index: 3, kind: input, shape index: {}]   ;;  %s3478_s4 = inlined_call_operand.hbm [shape: bf16[32,32], index: 4, kind: input, shape index: {}]   ;;  %s3479_s5 = inlined_call_operand.vmem [shape: f32[1,32], index: 5, kind: input, shape index: {}]   ;;  %s3480_s6 = inlined_call_operand.vmem [shape: f32[1,32], index: 6, kind: input, shape index: {}]   ;;  %s3481_s7 = inlined_call_operand.hbm [shape: bf16[32,64], index: 7, kind: input, shape index: {}]   ;;  %s3482_s8 = inlined_call_operand.vmem [shape: f32[1,64], index: 8, kind: input, shape index: {}]   ;;  %s3483_s9 = inlined_call_operand.vmem [shape: bf16[64,32], index: 9, kind: input, shape index: {}]   ;;  %s3484_s10 = inlined_call_operand.vmem [shape: f32[1,32], index: 10, kind: input, shape index: {}]   ;;  %s3485_s11 = inlined_call_operand.vmem [shape: f32[1,32], index: 11, kind: input, shape index: {}]   ;;  %s3486_s12 = inlined_call_operand.vmem [shape: f32[1,32], index: 12, kind: input, shape index: {}]   ;;  %s3487_s13 = inlined_call_operand.hbm [shape: f32[2,8,32], index: 13, kind: output, shape index: {0}]   ;;  %s3488_s14 = inlined_call_operand.hbm [shape: bf16[2,4,8,8], index: 14, kind: output, shape index: {1}]  }
   0x1   :  { %3498 = sst [smem:[#allocation20_spill]] %s3474_s0 }
   0x2   :  { %3499 = sst [smem:[#allocation21_spill]] %s3475_s1 }
   0x3   :  { %3500 = sst [smem:[#allocation22_spill]] %s3482_s8 }
   0x4   :  { %3501 = sst [smem:[#allocation23_spill]] %s3484_s10 }
   0x5   :  { %3502 = sst [smem:[#allocation24_spill]] %s3485_s11 }
   0x6   :  { %3503 = sst [smem:[#allocation25_spill]] %s3486_s12 }
   0x7   :  { %3504 = sst [smem:[#allocation26_spill]] %s3487_s13 }
   0x8   :  { %3505 = sst [smem:[#allocation27_spill]] %s3488_s14 }
   0x9   :  { %20 = vsyncpa [#allocation5], 0 }
   0xa   :  { %22 = vsyncpa [#allocation5 + $0x1], 0 }
   0xb   :  { %23 = vsyncpa [#allocation8], 0 }
   0xc   :  { %24 = vsyncpa [#allocation6], 0 }
   0xd   :  { %26 = vsyncpa [#allocation6 + $0x1], 0 }
   0xe   :  { %27 = vsyncpa [#allocation12], 0 }
   0xf   :  { %29 = vsyncpa [#allocation12 + $0x1], 0  ;;  %s2943_s29 = smov 0   ;;  %s2945_s30 = smov 0  }
  0x10   :  { %s2947_s15 = smov 0   ;;  %s2949_s16 = smov 0  }
  0x11   :  { %s2951_s17 = smov 0   ;;  %s2953_s18 = smov 0  }
  0x12 LB: > { %3506 = sst [smem:[#allocation17_spill]] %s2826_s29  ;;  %s2311_s19 = sadd.s32 4294967295, %s2846_s18   ;;  %s2846_s18 = sphi %s2953_s18, %s35_s18   ;;  %s2842_s17 = sphi %s2951_s17, %s3538_s17   ;;  %s2838_s16 = sphi %s2949_s16, %s3537_s16   ;;  %s2834_s15 = sphi %s2947_s15, %s3536_s15   ;;  %s2830_s30 = sphi %s2945_s30, %s3535_s30   ;;  %s2826_s29 = sphi %s2943_s29, %s3534_s29  }
  0x13   : > { %3507 = sst [smem:[#allocation18_spill]] %s2838_s16  ;;  %s2312_s20 = sadd.s32 4294967294, %s2846_s18  }
  0x14   : > { %p67_p0 = scmp.ne.s32.totalorder %s2830_s30, %s2826_s29  ;;  %p2977_p1 = scmp.eq.s32.totalorder %s2311_s19, 0 }
  0x15   : > { %p2981_p2 = scmp.eq.s32.totalorder %s2311_s19, 1  ;;  %p351_p3 = scmp.eq.s32.totalorder %s2312_s20, 1 }
  0x16   : > { %s3508_s21 = scalar_select %p2977_p1, 1, 0 }
  0x17   : > { %p2987_p4 = por %p2977_p1, %p67_p0  ;;  %p2313_p5 = scmp.ge.s32.totalorder %s2846_s18, 1 }
  0x18   : > { %p2992_p6 = por %p351_p3, %p67_p0  ;;  %p386_p7 = scmp.lt.s32.totalorder %s2846_s18, 3 }
  0x19   : > { %s3510_s23 = scalar_select %p2987_p4, 1, 0 }
  0x1a   : > { %s3511_s24 = scalar_select %p2992_p6, 1, 0 }
  0x1b   : > { %p2997_p8 = pnand %p2313_p5, %p386_p7  ;;  %s2848_s26 = smov [#allocation7]  }
  0x1c   : > { %3512 = sst [smem:[#allocation19_spill]] %s3511_s24  ;;  %s407_s27 = sshll.u32 %s2848_s26, 4  ;;  %s3001_s27 = int_to_ptr.vmem [resolvable:$true] %s407_s27 }
  0x1d   : > { %p2519_p9 = pneg %p2997_p8  ;;  %s2849_s19 = smov [#allocation9]  }
  0x1e   : > { %s426_s20 = sshll.u32 %s2849_s19, 4  ;;  %s2642_s26 = scalar_lea.hbm %s3478_s4, 256  ;;  %s3012_s20 = int_to_ptr.vmem [resolvable:$true] %s426_s20 }
  0x1f   : > { %p3008_p11 = pnand %p2519_p9, %p2977_p1  ;;  %p2643_p12 = scmp.ne.s32.totalorder %s3478_s4, %s2642_s26 }
  0x20   : > { %p2649_p5 = scmp.lt.u32.totalorder %s2642_s26, %s3478_s4 }
  0x21   : > { %p2644_p13 = pneg %p3008_p11 }
  0x23   : > { %p2645_p0 = pnand %p2644_p13, %p2643_p12 }
  0x25   : > { %p2646_p3 = pneg %p2645_p0 }
  0x27   : > { %p2651_p7 = pnand %p2649_p5, %p2646_p3 }
  0x29   : > { %2654 = shalt.err (!%p2651_p7)
}
  0x2a   : > { %s2655_s29 = scalar_lea.vmem %s3001_s27, 256  ;;  %p2663_p1 = scmp.lt.s32.totalorder %s3001_s27, %s3001_s27 }
  0x2b   : > { %p2656_p9 = scmp.ne.s32.totalorder %s3001_s27, %s2655_s29  ;;  %p2664_p12 = scmp.lt.s32.totalorder %s2655_s29, %s2655_s29 }
  0x2d   : > { %p2658_p10 = pnand %p2656_p9, %p2644_p13  ;;  %p2665_p0 = por %p2664_p12, %p2663_p1 }
  0x2f   : > { %p2659_p6 = pneg %p2658_p10 }
  0x31   : > { %p2666_p4 = pnand %p2665_p0, %p2659_p6 }
  0x33   : > { %2669 = shalt.err (!%p2666_p4)
}
  0x34   : > { %s2850_s11 = smov 64   ;;  %s2851_s12 = smov 4  }
  0x35   : > { %2522 = dma.hbm_to_vmem [thread:$0]  (!%p3008_p11), %s3478_s4, 256, %s3001_s27, [#allocation8], %s2850_s11, %s2850_s11, %s2851_s12  }
  0x36   : > { %s2670_s26 = scalar_lea.hbm %s3481_s7, 256 }
  0x37   : > { %p2671_p1 = scmp.ne.s32.totalorder %s3481_s7, %s2670_s26  ;;  %p2677_p10 = scmp.lt.u32.totalorder %s2670_s26, %s3481_s7 }
  0x39   : > { %p2673_p4 = pnand %p2671_p1, %p2644_p13 }
  0x3b   : > { %p2674_p6 = pneg %p2673_p4 }
  0x3d   : > { %p2679_p3 = pnand %p2677_p10, %p2674_p6 }
  0x3f   : > { %2682 = shalt.err (!%p2679_p3)
}
  0x40   : > { %s2683_s27 = scalar_lea.vmem %s3012_s20, 256  ;;  %p2691_p12 = scmp.lt.s32.totalorder %s3012_s20, %s3012_s20 }
  0x41   : > { %p2684_p5 = scmp.ne.s32.totalorder %s3012_s20, %s2683_s27  ;;  %p2692_p0 = scmp.lt.s32.totalorder %s2683_s27, %s2683_s27 }
  0x43   : > { %p2686_p7 = pnand %p2684_p5, %p2644_p13  ;;  %p2693_p1 = por %p2692_p0, %p2691_p12 }
  0x45   : > { %p2687_p9 = pneg %p2686_p7 }
  0x47   : > { %p2694_p4 = pnand %p2693_p1, %p2687_p9 }
  0x49   : > { %2697 = shalt.err (!%p2694_p4)
}
  0x4a   : > { %2525 = dma.hbm_to_vmem [thread:$0]  (!%p3008_p11), %s3481_s7, 256, %s3012_s20, [#allocation8], %s2850_s11, %s2850_s11, %s2851_s12  }
  0x4b   : > { %s47_s16 = sadd.s32 1, %s2842_s17  ;;  %s54_s13 = sadd.s32 1, %s2834_s15 }
  0x4c   : > { %p49_p13 = scmp.ge.s32.totalorder %s47_s16, 2  ;;  %p61_p6 = scmp.ne.s32.totalorder %s2834_s15, %s2830_s30 }
  0x4d   : > { %p62_p10 = scmp.eq.s32.totalorder %s2846_s18, 0  ;;  %p2539_p3 = scmp.lt.s32.totalorder %s2846_s18, 2 }
  0x4e   : > { %s3540_s16 = smov (%p49_p13, %s47_s16), 0  ;;  %p3076_p7 = por %p2981_p2, %p61_p6 }
  0x4f   : > { %p63_p5 = por %p62_p10, %p61_p6  ;;  %s51_s14 = ssub.s32 %s2842_s17, %s3540_s16 }
  0x50   : > { %s3515_s28 = scalar_select %p3076_p7, 1, 0 }
  0x51   : > { %s455_s24 = sand.u32 1, %s2834_s15   ;;  %p52_p9 = scmp.eq.s32.totalorder %s51_s14, 0 }
  0x52   : > { %s2317_s20 = sshll.u32 %s455_s24, 2  ;;  %s2318_s11 = sshll.u32 %s2842_s17, 6 }
  0x53   : > { %s3085_s12 = scalar_select %p52_p9, %s2834_s15, %s54_s13  }
  0x54   : > { %s3516_s0 = sld [smem:[#allocation20_spill]]  ;;  %s459_s22 = scalar_lea.vmem [#allocation4], %s2317_s20 }
  0x55   : > { %s466_s27 = sshll.u32 %s459_s22, 4  ;;  %p3094_p2 = pnand %p2539_p3, %p63_p5  ;;  %s3098_s27 = int_to_ptr.vmem [resolvable:$true] %s466_s27 }
  0x56   : > { %s456_s10 = scalar_lea.sflag [#allocation5], %s455_s24 }
  0x57   : > { %p2700_p12 = pneg %p3094_p2 }
  0x5a   : > { %s3090_s29 = scalar_lea.hbm %s3516_s0, %s2318_s11  ;;  %s2703_s11 = scalar_lea.hbm %s3516_s0, 128 }
  0x5b   : > { %s2698_s13 = scalar_lea.hbm %s3090_s29, 64  ;;  %p2704_p4 = scmp.lt.u32.totalorder %s3090_s29, %s3516_s0 }
  0x5c   : > { %p2699_p11 = scmp.ne.s32.totalorder %s3090_s29, %s2698_s13  ;;  %p2705_p13 = scmp.lt.u32.totalorder %s2703_s11, %s2698_s13 }
  0x5d   : > { %p2707_p10 = scmp.lt.u32.totalorder %s2698_s13, %s3090_s29 }
  0x5e   : > { %p2701_p0 = pnand %p2700_p12, %p2699_p11  ;;  %p2706_p6 = por %p2705_p13, %p2704_p4 }
  0x60   : > { %p2702_p1 = pneg %p2701_p0  ;;  %p2708_p3 = por %p2707_p10, %p2706_p6 }
  0x62   : > { %p2709_p5 = pnand %p2708_p3, %p2702_p1 }
  0x64   : > { %2712 = shalt.err (!%p2709_p5)
}
  0x65   : > { %s2713_s24 = scalar_lea.vmem %s3098_s27, 64  ;;  %s2852_s22 = smov [#allocation4]  }
  0x66   : > { %p2714_p9 = scmp.ne.s32.totalorder %s3098_s27, %s2713_s24  ;;  %s2718_s14 = sshll.u32 %s2852_s22, 4  ;;  %s2719_s14 = int_to_ptr.vmem [resolvable:$false] %s2718_s14 }
  0x67   : > { %s2720_s20 = scalar_lea.vmem %s2719_s14, 128  ;;  %p2721_p7 = scmp.lt.s32.totalorder %s3098_s27, %s2719_s14 }
  0x68   : > { %p2716_p11 = pnand %p2714_p9, %p2700_p12  ;;  %p2722_p4 = scmp.lt.s32.totalorder %s2720_s20, %s2713_s24 }
  0x6a   : > { %p2717_p0 = pneg %p2716_p11  ;;  %p2723_p13 = por %p2722_p4, %p2721_p7 }
  0x6c   : > { %p2724_p6 = pnand %p2723_p13, %p2717_p0 }
  0x6e   : > { %2727 = shalt.err (!%p2724_p6)
}
  0x6f   : > { %2529 = dma.hbm_to_vmem [thread:$0]  (!%p3094_p2), %s3090_s29, 64, %s3098_s27, %s456_s10  }
  0x70   : > { %475 = sbr.rel (%p2997_p8) target bundleno = 2824 (0xb08), region = 72  ;;  %s3128_s13 = sand.u32 (!%p2997_p8), 1, %s2830_s30  }
  0x71   : > { %s2320_s11 = sshll.u32 (!%p2997_p8), %s3128_s13, 2  ;;  %s478_s19 = scalar_lea.sflag (!%p2997_p8), [#allocation5], %s3128_s13 }
  0x72   : > { %s481_s26 = scalar_lea.vmem (!%p2997_p8), [#allocation4], %s2320_s11  ;;  %p3518_p7 = scmp.ne.s32.totalorder (!%p2997_p8), %s3510_s23, 0 }
  0x77   : > { %2809 = dma.done.wait (%p3518_p7), %s478_s19, 64  }
  0x78   : > { %2811 = vsyncadd (%p3518_p7), %s478_s19, 4294967232  ;;  %p3519_p12 = scmp.ne.s32.totalorder %s3508_s21, 0 }
  0x7a   : > { %2813 = dma.done.wait (%p3519_p12), [#allocation8], 512  }
  0x7b   : > { %2815 = vsyncadd (%p3519_p12), [#allocation8], 4294966784  ;;  %v2853_v0 = vmov 0.0   ;;  %vm2854_vm0 = vmmov 0   ;;  %v2608_v1 = vld [vmem:[%s3476_s2] sm:$0xff]   ;;  %v2609_v2 = vld [vmem:[%s3476_s2 + $0x8] sm:$0xff]   ;;  %v672_v22 = vlaneseq }
  0x7c   : > { %2405 = vmatprep.subr.bf16.mxu0 %v2853_v0  ;;  %2409 = vmatprep.mubr.msk.bf16.mxu0 %vm2854_vm0, %v2853_v0  ;;  %v544_v3 = vld [vmem:[%s481_s26] sm:$0xf]  ;;  %vm561_vm1 = vcmask 261120   ;;  %s3520_s1 = sld [smem:[#allocation21_spill]]  ;;  %s2855_s22 = smov 104   ;;  %v2613_v19 = vld [vmem:[%s3477_s3 + $0x8] sm:$0xff]  }
  0x7d   : > { %2413 = vmatprep.subr.bf16.mxu1 %v2853_v0  ;;  %2417 = vmatprep.mubr.msk.bf16.mxu1 %vm2854_vm0, %v2853_v0  ;;  %v3164_v6 = vld [vmem:[%s481_s26] sm:$0xf]  ;;  %s2856_s14 = smov 120   ;;  %s2857_s20 = smov 112   ;;  %v2858_v20 = vmov 1983009808  }
  0x7e   : > { %2406 = vmatpush3.bf16.msra.mxu0 %v2608_v1  ;;  %v2612_v18 = vld [vmem:[%s3477_s3] sm:$0xff]   ;;  %v670_v21 = vunpack.c.l.s4 %v2858_v20  ;;  %v2859_v23 = vmov 1934713408   ;;  %v673_v26 = vshrl.u32 %v672_v22, 7  ;;  %v2860_v43 = vmov 0   ;;  %s2324_s25 = sshll.u32 %s3128_s13, 4 }
  0x7f   : > { %2407 = vmatprep.subr.bf16.mxu0 %v2853_v0  ;;  %2414 = vmatpush3.bf16.msra.mxu1 %v2612_v18  ;;  %v687_v24 = vunpack.c.l.s4 %v2859_v23  ;;  %vm834_vm2 = vcmask 60416   ;;  %vm1096_vm3 = vcmask 64512   ;;  %s3292_s29 = scalar_lea.vmem [#allocation11], %s2324_s25  ;;  %s2861_s21 = smov 16   ;;  %vm1863_vm4 = vcmask 130048  }
  0x80   : > { %2415 = vmatprep.subr.bf16.mxu1 %v2853_v0  ;;  %v671_v25 = vunpack.c.0.s8 %v670_v21  ;;  %s2862_s27 = smov 8   ;;  %s2863_s8 = smov 24   ;;  %vm1865_vm5 = vcmask 195584   ;;  %vm2065_vm6 = vcmask 523264  }
  0x81   : > { %v688_v27 = vunpack.c.0.s8 %v687_v24  ;;  %s3521_s24 = sld [smem:[#allocation22_spill]]  ;;  %s3523_s11 = sld [smem:[#allocation18_spill]] }
  0x82   : > { %v2610_v4 = vld [vmem:[%s3520_s1] sm:$0xff]   ;;  %2408 = vmatpush3.bf16.msra.mxu0 %v2609_v2  ;;  %v2611_v5 = vld [vmem:[%s3520_s1 + $0x8] sm:$0xff]   ;;  %v3193_v28 = vsub.s32 %v671_v25, %v673_v26  ;;  %s2174_s26 = sshll.u32 %s3292_s29, 4  ;;  %p3525_p2 = scmp.ne.s32.totalorder %s3515_s28, 0  ;;  %s3387_s26 = int_to_ptr.vmem [resolvable:$true] %s2174_s26 }
  0x83   : > { %2421 = vmatprep.subr.bf16.mxu0 %v2853_v0  ;;  %2416 = vmatpush3.bf16.msra.mxu1 %v2613_v19  ;;  %v3196_v32 = vsub.s32 %v688_v27, %v673_v26  ;;  %s2728_s10 = scalar_lea.vmem %s3387_s26, 256 }
  0x84   : > { %2429 = vmatprep.subr.bf16.mxu1 %v2853_v0  ;;  %p2729_p8 = scmp.ne.s32.totalorder %s3387_s26, %s2728_s10 }
  0x85   : > { %2410 = vmatmul.mubr.msk.bf16.vlgmr.msra.gmra.mrb[0].mxu0 %vm561_vm1, %v544_v3 }
  0x86   : > { %2422 = vmatpush3.bf16.msra.mxu0 %v2610_v4  ;;  %2425 = vmatprep.mubr.msk.bf16.mxu0 %vm2854_vm0, %v2853_v0  ;;  %p2730_p1 = pnand %p2729_p8, %p3525_p2 }
  0x87   : > { %2423 = vmatprep.subr.bf16.mxu0 %v2853_v0  ;;  %2418 = vmatmul.mubr.msk.bf16.vlgmr.msra.gmra.mrb[0].mxu1 %vm561_vm1, %v544_v3  ;;  %s2368_s19 = sshll.u32 %s3523_s11, 8 }
  0x88   : > { %2431 = vmatprep.mubr.msk.bf16.mxu1 %vm2854_vm0, %v2853_v0  ;;  %p2731_p10 = pneg %p2730_p1 }
  0x8a   : > { %2424 = vmatpush3.bf16.msra.mxu0 %v2611_v5 }
  0x8b   : > { %2435 = vmatprep.subr.bf16.mxu0 %v2853_v0 }
  0x8d   : > { %2426 = vmatmul.mubr.msk.bf16.vlgmr.msra.gmra.mrb[4].mxu0 %vm561_vm1, %v3164_v6 }
  0x8e   : > { %2437 = vmatprep.mubr.msk.bf16.mxu0 %vm2854_vm0, %v2853_v0 }
 0x158   : > { %v599_v7 = vpop.f32.mrb[0].mxu0 }
 0x159   : > { %v661_v8 = vpack.c.bf16 %v599_v7, %v599_v7  ;;  %v2411_v9 = vpop.f32.mrb[1].mxu0 }
 0x15a   : > { %v602_v10 = vpop.f32.mrb[2].mxu0 }
 0x15b   : > { %667 = vrot.lane.b32.xlu1 %v661_v8, %s2855_s22  ;;  %663 = vrot.lane.b32.xlu0 %v661_v8, %s2856_s14  ;;  %v2412_v11 = vpop.f32.mrb[3].mxu0  ;;  %v675_v39 = vrot.slane %v661_v8, %v3193_v28 }
 0x15f   : > { %665 = vrot.lane.b32.xlu0 %v661_v8, %s2857_s20 }
 0x160   : > { %v1077_v12 = vpop.f32.mrb[4].mxu0 }
 0x161   : > { %v1083_v13 = vmul.f32 0.35355338, %v1077_v12  ;;  %v2427_v14 = vpop.f32.mrb[5].mxu0 }
 0x162   : > { %v1080_v15 = vpop.f32.mrb[6].mxu0 }
 0x163   : > { %v3174_v16 = vpack.c.bf16 %v1083_v13, %v1083_v13  ;;  %v2428_v17 = vpop.f32.mrb[7].mxu0 }
 0x165   : > { %1086 = vrot.lane.b32.xlu1 %v3174_v16, %s2856_s14  ;;  %1088 = vrot.lane.b32.xlu0 %v3174_v16, %s2857_s20 }
 0x169   : > { %1090 = vrot.lane.b32.xlu1 %v3174_v16, %s2855_s22 }
 0x1cd   : > { %v668_v29 = vpop.permute.xlu1 %667  ;;  %v664_v30 = vpop.permute.xlu0 %663 }
 0x1ce   : > { %v717_v31 = vrot.slane %v668_v29, %v3193_v28  ;;  %v709_v33 = vrot.slane %v664_v30, %v3193_v28 }
 0x1d0   : > { %v718_v34 = vcombine.low %v709_v33, %v717_v31  ;;  %v719_v35 = vcombine.high %v709_v33, %v717_v31 }
 0x1d1   : > { %v666_v36 = vpop.permute.xlu0 %665 }
 0x1d2   : > { %v726_v37 = vrot.slane %v718_v34, %v3196_v32  ;;  %v683_v38 = vrot.slane %v666_v36, %v3193_v28  ;;  %v733_v40 = vrot.slane %v719_v35, %v3196_v32 }
 0x1d4   : > { %v684_v41 = vcombine.low %v675_v39, %v683_v38  ;;  %v685_v42 = vcombine.high %v675_v39, %v683_v38  ;;  %v734_v44 = vcombine.high %v726_v37, %v2860_v43  ;;  %v735_v47 = vcombine.high %v733_v40, %v2860_v43  ;;  %v655_v39 = vpop.f32.mrb[0].mxu1 }
 0x1d5   : > { %v741_v48 = vshrl.u32 %v726_v37, 16  ;;  %v757_v54 = vshrl.u32 %v733_v40, 16 }
 0x1d6   : > { %v692_v45 = vrot.slane %v684_v41, %v3196_v32  ;;  %v699_v46 = vrot.slane %v685_v42, %v3196_v32  ;;  %v749_v53 = vshrl.u32 %v734_v44, 16  ;;  %v765_v61 = vshrl.u32 %v735_v47, 16 }
 0x1d7   : > { %v1087_v36 = vpop.permute.xlu1 %1086 }
 0x1d8   : > { %v700_v49 = vcombine.high %v692_v45, %v2860_v43  ;;  %v701_v50 = vcombine.high %v699_v46, %v2860_v43  ;;  %v738_v51 = vpack.i.b16 %v726_v37, %v692_v45  ;;  %v740_v52 = vshrl.u32 %v692_v45, 16 }
 0x1d9   : > { %v754_v55 = vpack.i.b16 %v733_v40, %v699_v46  ;;  %v756_v56 = vshrl.u32 %v699_v46, 16  ;;  %v2419_v40 = vpop.f32.mrb[1].mxu1 }
 0x1da   : > { %v742_v57 = vpack.i.b16 %v741_v48, %v740_v52  ;;  %v746_v58 = vpack.i.b16 %v734_v44, %v700_v49  ;;  %v748_v59 = vshrl.u32 %v700_v49, 16  ;;  %v762_v60 = vpack.i.b16 %v735_v47, %v701_v50  ;;  %v658_v41 = vpop.f32.mrb[2].mxu1 }
 0x1db   : > { %v758_v62 = vpack.i.b16 %v757_v54, %v756_v56  ;;  %v764_v63 = vshrl.u32 %v701_v50, 16  ;;  %v768_v1 = vcombine.low %v738_v51, %v754_v55  ;;  %v1091_v38 = vpop.permute.xlu1 %1090  ;;  %v2420_v42 = vpop.f32.mrb[3].mxu1 }
 0x1dc   : > { %v750_v2 = vpack.i.b16 %v749_v53, %v748_v59  ;;  %v776_v3 = vcombine.low %v746_v58, %v762_v60 }
 0x1dd   : > { %v766_v4 = vpack.i.b16 %v765_v61, %v764_v63  ;;  %v793_v5 = vcombine.low %v742_v57, %v758_v62  ;;  %v775_v7 = vrot.slane %v768_v1, %v3193_v28  ;;  %v839_v1 = vpack.c.bf16 %v655_v39, %v655_v39 }
 0x1de   : > { %v783_v8 = vrot.slane %v776_v3, %v3193_v28 }
 0x1df   : > { %v801_v9 = vcombine.low %v750_v2, %v766_v4  ;;  %v800_v11 = vrot.slane %v793_v5, %v3193_v28 }
 0x1e0   : > { %v784_v10 = vcombine.low %v775_v7, %v783_v8 }
 0x1e1   : > { %v808_v12 = vrot.slane %v801_v9, %v3193_v28 }
 0x1e2   : > { %v791_v13 = vrot.slane %v784_v10, %v3196_v32 }
 0x1e3   : > { %v809_v14 = vcombine.low %v800_v11, %v808_v12 }
 0x1e4   : > { %v792_v15 = vcombine.high %v791_v13, %v2860_v43  ;;  %v822_v20 = vshrl.u32 %v791_v13, 16 }
 0x1e5   : > { %v816_v17 = vrot.slane %v809_v14, %v3196_v32 }
 0x1e6   : > { %v830_v24 = vshrl.u32 %v792_v15, 16 }
 0x1e7   : > { %v817_v18 = vcombine.high %v816_v17, %v2860_v43  ;;  %v820_v19 = vpack.i.b16 %v816_v17, %v791_v13  ;;  %v823_v21 = vshrl.u32 %v816_v17, 16 }
 0x1e9   : > { %v824_v22 = vpack.i.b16 %v823_v21, %v822_v20  ;;  %v828_v23 = vpack.i.b16 %v817_v18, %v792_v15  ;;  %v831_v25 = vshrl.u32 %v817_v18, 16  ;;  %835 = vst.msk [vmem:[#allocation2] sm:$0xf] %vm834_vm2, %v820_v19 }
 0x1eb   : > { %v832_v26 = vpack.i.b16 %v831_v25, %v830_v24  ;;  %836 = vst.msk [vmem:[#allocation2 + $0x4] sm:$0xf] %vm834_vm2, %v824_v22  ;;  %837 = vst.msk [vmem:[#allocation2 + $0x8] sm:$0xf] %vm834_vm2, %v828_v23 }
 0x1ed   : > { %838 = vst.msk [vmem:[#allocation2 + $0xc] sm:$0xf] %vm834_vm2, %v832_v26 }
 0x1f0   : > { %v1092_v27 = vld [vmem:[#allocation2] sm:$0xf] }
 0x1f1   : > { %v1101_v29 = vsel %vm1096_vm3, %v1092_v27, 0  ;;  %v853_v27 = vrot.slane %v839_v1, %v3193_v28 }
 0x1f2   : > { %2430 = vmatpush3.bf16.xpose.msra.mxu1 %v1101_v29  ;;  %v1093_v30 = vld [vmem:[#allocation2 + $0x4] sm:$0xf]  ;;  %v1094_v33 = vld [vmem:[#allocation2 + $0x8] sm:$0xf] }
 0x1f3   : > { %v1147_v31 = vsel %vm1096_vm3, %v1093_v30, 0  ;;  %2441 = vmatprep.subr.bf16.mxu1 %v2853_v0  ;;  %v1193_v35 = vsel %vm1096_vm3, %v1094_v33, 0 }
 0x1f4   : > { %2436 = vmatpush3.bf16.xpose.msra.mxu0 %v1147_v31  ;;  %v1095_v34 = vld [vmem:[#allocation2 + $0xc] sm:$0xf] }
 0x1f5   : > { %2447 = vmatprep.subr.bf16.mxu0 %v2853_v0  ;;  %v1239_v37 = vsel %vm1096_vm3, %v1095_v34, 0 }
 0x1f9   : > { %2432 = vmatmul.mubr.msk.bf16.vlgmr.msra.gmra.mrb[4].mxu1 %vm1096_vm3, %v3174_v16  ;;  %v1089_v16 = vpop.permute.xlu0 %1088 }
 0x1fa   : > { %2442 = vmatpush3.bf16.xpose.msra.mxu1 %v1193_v35  ;;  %2443 = vmatprep.mubr.msk.bf16.mxu1 %vm2854_vm0, %v2853_v0 }
 0x1fb   : > { %2438 = vmatmul.mubr.msk.bf16.vlgmr.msra.gmra.mrb[8].mxu0 %vm1096_vm3, %v1087_v36  ;;  %2453 = vmatprep.subr.bf16.mxu1 %v2853_v0 }
 0x1fc   : > { %2448 = vmatpush3.bf16.xpose.msra.mxu0 %v1239_v37  ;;  %2449 = vmatprep.mubr.msk.bf16.mxu0 %vm2854_vm0, %v2853_v0 }
 0x1fd   : > { %2459 = vmatprep.subr.bf16.mxu0 %v2853_v0 }
 0x201   : > { %2444 = vmatmul.mubr.msk.bf16.vlgmr.msra.gmra.mrb[8].mxu1 %vm1096_vm3, %v1089_v16 }
 0x202   : > { %2455 = vmatprep.mubr.msk.bf16.mxu1 %vm2854_vm0, %v2853_v0 }
 0x203   : > { %2450 = vmatmul.mubr.msk.bf16.vlgmr.msra.gmra.mrb[12].mxu0 %vm1096_vm3, %v1091_v38 }
 0x204   : > { %2461 = vmatprep.mubr.msk.bf16.mxu0 %vm2854_vm0, %v2853_v0 }
 0x2cc   : > { %v1137_v44 = vpop.f32.mrb[4].mxu1 }
 0x2cd   : > { %v2433_v45 = vpop.f32.mrb[5].mxu1  ;;  %v1281_v46 = vsel %vm1096_vm3, %v1137_v44, -inf }
 0x2ce   : > { %1282 = vmax.xlane.f32.xlu0 %v1281_v46  ;;  %v1140_v47 = vpop.f32.mrb[6].mxu1  ;;  %v1183_v48 = vpop.f32.mrb[8].mxu0 }
 0x2cf   : > { %v2434_v49 = vpop.f32.mrb[7].mxu1  ;;  %v2439_v50 = vpop.f32.mrb[9].mxu0  ;;  %v1284_v51 = vsel %vm1096_vm3, %v1183_v48, -inf }
 0x2d0   : > { %1285 = vmax.xlane.f32.xlu1 %v1284_v51  ;;  %v1186_v52 = vpop.f32.mrb[10].mxu0 }
 0x2d1   : > { %v2440_v53 = vpop.f32.mrb[11].mxu0 }
 0x2d4   : > { %v1229_v54 = vpop.f32.mrb[8].mxu1 }
 0x2d5   : > { %v2445_v55 = vpop.f32.mrb[9].mxu1  ;;  %v1287_v56 = vsel %vm1096_vm3, %v1229_v54, -inf }
 0x2d6   : > { %1288 = vmax.xlane.f32.xlu0 %v1287_v56  ;;  %v1232_v57 = vpop.f32.mrb[10].mxu1  ;;  %v1275_v58 = vpop.f32.mrb[12].mxu0 }
 0x2d7   : > { %v2446_v59 = vpop.f32.mrb[11].mxu1  ;;  %v2451_v60 = vpop.f32.mrb[13].mxu0  ;;  %v1290_v63 = vsel %vm1096_vm3, %v1275_v58, -inf }
 0x2d8   : > { %v1278_v61 = vpop.f32.mrb[14].mxu0 }
 0x2d9   : > { %v2452_v62 = vpop.f32.mrb[15].mxu0 }
 0x2da   : > { %1291 = vmax.xlane.f32.xlu0 %v1290_v63 }
 0x2e1   : > { %841 = vrot.lane.b32.xlu1 %v839_v1, %s2856_s14 }
 0x2e5   : > { %845 = vrot.lane.b32.xlu1 %v839_v1, %s2855_s22 }
 0x2f0   : > { %843 = vrot.lane.b32.xlu0 %v839_v1, %s2857_s20  ;;  %s3522_s20 = sld [smem:[#allocation23_spill]] }
 0x35b   : > { %v1283_v2 = vpop.xlane.xlu0 %1282 }
 0x35c   : > { %v1293_v3 = vsub.f32 %v1137_v44, %v1283_v2 }
 0x35d   : > { %v1286_v4 = vpop.xlane.xlu1 %1285 }
 0x35e   : > { %v1297_v5 = vmul.f32 1.442695, %v1293_v3  ;;  %v1294_v7 = vsub.f32 %v1183_v48, %v1286_v4 }
 0x360   : > { %2622 = vpow2.f32 %v1297_v5  ;;  %v1299_v8 = vmul.f32 1.442695, %v1294_v7 }
 0x361   : > { %v842_v9 = vpop.permute.xlu1 %841 }
 0x362   : > { %2624 = vpow2.f32 %v1299_v8  ;;  %v887_v13 = vrot.slane %v842_v9, %v3193_v28 }
 0x363   : > { %v1289_v10 = vpop.xlane.xlu0 %1288 }
 0x364   : > { %v1295_v11 = vsub.f32 %v1229_v54, %v1289_v10 }
 0x365   : > { %v846_v12 = vpop.permute.xlu1 %845 }
 0x366   : > { %v1301_v14 = vmul.f32 1.442695, %v1295_v11  ;;  %v895_v15 = vrot.slane %v846_v12, %v3193_v28 }
 0x367   : > { %v1292_v17 = vpop.xlane.xlu0 %1291 }
 0x368   : > { %2626 = vpow2.f32 %v1301_v14  ;;  %v896_v18 = vcombine.low %v887_v13, %v895_v15  ;;  %v1296_v19 = vsub.f32 %v1275_v58, %v1292_v17  ;;  %v897_v21 = vcombine.high %v887_v13, %v895_v15 }
 0x36a   : > { %v3251_v20 = vpop.eup %2622  ;;  %v1303_v22 = vmul.f32 1.442695, %v1296_v19  ;;  %v904_v26 = vrot.slane %v896_v18, %v3196_v32  ;;  %v911_v31 = vrot.slane %v897_v21, %v3196_v32 }
 0x36b   : > { %v844_v23 = vpop.permute.xlu0 %843  ;;  %v1305_v24 = vsel %vm1096_vm3, %v3251_v20, 0.0 }
 0x36c   : > { %v3255_v25 = vpop.eup %2624  ;;  %1306 = vadd.xlane.f32.xlu1 %v1305_v24  ;;  %2628 = vpow2.f32 %v1303_v22  ;;  %v861_v29 = vrot.slane %v844_v23, %v3193_v28  ;;  %v912_v35 = vcombine.high %v904_v26, %v2860_v43  ;;  %v913_v38 = vcombine.high %v911_v31, %v2860_v43 }
 0x36d   : > { %v1308_v30 = vsel %vm1096_vm3, %v3255_v25, 0.0  ;;  %v919_v39 = vshrl.u32 %v904_v26, 16  ;;  %v935_v40 = vshrl.u32 %v911_v31, 16 }
 0x36e   : > { %1309 = vadd.xlane.f32.xlu0 %v1308_v30  ;;  %v862_v33 = vcombine.low %v853_v27, %v861_v29  ;;  %v863_v34 = vcombine.high %v853_v27, %v861_v29  ;;  %v927_v46 = vshrl.u32 %v912_v35, 16  ;;  %v943_v54 = vshrl.u32 %v913_v38, 16 }
 0x370   : > { %v870_v36 = vrot.slane %v862_v33, %v3196_v32  ;;  %v877_v37 = vrot.slane %v863_v34, %v3196_v32 }
 0x372   : > { %v3266_v16 = vpop.eup %2626  ;;  %v878_v41 = vcombine.high %v870_v36, %v2860_v43  ;;  %v879_v42 = vcombine.high %v877_v37, %v2860_v43  ;;  %v916_v44 = vpack.i.b16 %v904_v26, %v870_v36  ;;  %v918_v45 = vshrl.u32 %v870_v36, 16 }
 0x373   : > { %v932_v47 = vpack.i.b16 %v911_v31, %v877_v37  ;;  %v934_v48 = vshrl.u32 %v877_v37, 16  ;;  %v1311_v49 = vsel %vm1096_vm3, %v3266_v16, 0.0 }
 0x374   : > { %v920_v50 = vpack.i.b16 %v919_v39, %v918_v45  ;;  %v924_v51 = vpack.i.b16 %v912_v35, %v878_v41  ;;  %v926_v52 = vshrl.u32 %v878_v41, 16  ;;  %v940_v53 = vpack.i.b16 %v913_v38, %v879_v42  ;;  %1312 = vadd.xlane.f32.xlu0 %v1311_v49 }
 0x375   : > { %v936_v55 = vpack.i.b16 %v935_v40, %v934_v48  ;;  %v942_v56 = vshrl.u32 %v879_v42, 16  ;;  %v946_v57 = vcombine.low %v916_v44, %v932_v47 }
 0x376   : > { %v3273_v58 = vpop.eup %2628  ;;  %v928_v59 = vpack.i.b16 %v927_v46, %v926_v52  ;;  %v954_v60 = vcombine.low %v924_v51, %v940_v53 }
 0x377   : > { %v944_v61 = vpack.i.b16 %v943_v54, %v942_v56  ;;  %v971_v62 = vcombine.low %v920_v50, %v936_v55  ;;  %v1314_v63 = vsel %vm1096_vm3, %v3273_v58, 0.0  ;;  %v953_v1 = vrot.slane %v946_v57, %v3193_v28 }
 0x378   : > { %v961_v2 = vrot.slane %v954_v60, %v3193_v28  ;;  %1315 = vadd.xlane.f32.xlu1 %v1314_v63 }
 0x379   : > { %v979_v3 = vcombine.low %v928_v59, %v944_v61  ;;  %v978_v5 = vrot.slane %v971_v62, %v3193_v28 }
 0x37a   : > { %v962_v4 = vcombine.low %v953_v1, %v961_v2 }
 0x37b   : > { %v986_v7 = vrot.slane %v979_v3, %v3193_v28 }
 0x37c   : > { %v969_v8 = vrot.slane %v962_v4, %v3196_v32 }
 0x37d   : > { %v987_v9 = vcombine.low %v978_v5, %v986_v7 }
 0x37e   : > { %v970_v10 = vcombine.high %v969_v8, %v2860_v43  ;;  %v1000_v14 = vshrl.u32 %v969_v8, 16 }
 0x37f   : > { %v994_v11 = vrot.slane %v987_v9, %v3196_v32 }
 0x380   : > { %v1008_v19 = vshrl.u32 %v970_v10, 16 }
 0x381   : > { %v995_v12 = vcombine.high %v994_v11, %v2860_v43  ;;  %v998_v13 = vpack.i.b16 %v994_v11, %v969_v8  ;;  %v1001_v15 = vshrl.u32 %v994_v11, 16 }
 0x383   : > { %v1002_v17 = vpack.i.b16 %v1001_v15, %v1000_v14  ;;  %v1006_v18 = vpack.i.b16 %v995_v12, %v970_v10  ;;  %v1009_v21 = vshrl.u32 %v995_v12, 16  ;;  %1012 = vst.msk [vmem:[#allocation3] sm:$0xf] %vm834_vm2, %v998_v13 }
 0x385   : > { %v1010_v22 = vpack.i.b16 %v1009_v21, %v1008_v19  ;;  %1013 = vst.msk [vmem:[#allocation3 + $0x4] sm:$0xf] %vm834_vm2, %v1002_v17  ;;  %1014 = vst.msk [vmem:[#allocation3 + $0x8] sm:$0xf] %vm834_vm2, %v1006_v18 }
 0x387   : > { %1015 = vst.msk [vmem:[#allocation3 + $0xc] sm:$0xf] %vm834_vm2, %v1010_v22 }
 0x38a   : > { %v1334_v23 = vld [vmem:[#allocation3] sm:$0xf] }
 0x38c   : > { %v1335_v43 = vld [vmem:[#allocation3 + $0x4] sm:$0xf]  ;;  %v1336_v24 = vld [vmem:[#allocation3 + $0x8] sm:$0xf] }
 0x38e   : > { %v1337_v26 = vld [vmem:[#allocation3 + $0xc] sm:$0xf] }
 0x3a1   : > { %1338 = vxpose.xlu0.c.b16.start.end [1/1] (short) (narrow) %v1334_v23, 16  ;;  %v2614_v23 = vld [vmem:[#allocation7] sm:$0xff]  }
 0x3a5   : > { %1400 = vxpose.xlu1.c.b16.start.end [1/1] (short) (narrow) %v1335_v43, 16  ;;  %1462 = vxpose.xlu0.c.b16.start.end [1/1] (short) (narrow) %v1336_v24, 16 }
 0x3a9   : > { %1524 = vxpose.xlu1.c.b16.start.end [1/1] (short) (narrow) %v1337_v26, 16 }
 0x3f9   : > { %v1307_v27 = vpop.xlane.xlu1 %1306 }
 0x3fa   : > { %2630 = vrcp.f32 %v1307_v27 }
 0x3fb   : > { %v1310_v29 = vpop.xlane.xlu0 %1309 }
 0x3fc   : > { %2632 = vrcp.f32 %v1310_v29 }
 0x401   : > { %v1313_v30 = vpop.xlane.xlu0 %1312 }
 0x402   : > { %2634 = vrcp.f32 %v1313_v30 }
 0x404   : > { %v2631_v31 = vpop.eup %2630 }
 0x405   : > { %v1318_v33 = vmul.f32 %v2631_v31, %v3251_v20  ;;  %v1316_v35 = vpop.xlane.xlu1 %1315 }
 0x406   : > { %v2633_v34 = vpop.eup %2632  ;;  %2636 = vrcp.f32 %v1316_v35 }
 0x407   : > { %v1325_v36 = vpack.c.bf16 %v1318_v33, %v1318_v33  ;;  %v1320_v37 = vmul.f32 %v2633_v34, %v3255_v25  ;;  %v1346_v25 = vpop.trf.xlu0  ;;  %v2615_v34 = vld [vmem:[#allocation7 + $0x8] sm:$0xff]  }
 0x409   : > { %1330 = vst.msk [vmem:[%s3292_s29] sm:$0xf] %vm834_vm2, %v1325_v36  ;;  %v1358_v38 = vsel %vm1096_vm3, %v1325_v36, 0  ;;  %v1326_v39 = vpack.c.bf16 %v1320_v37, %v1320_v37 }
 0x40a   : > { %2454 = vmatpush3.bf16.xpose.msra.mxu1 %v1358_v38 }
 0x40b   : > { %1331 = vst.msk [vmem:[%s3292_s29 + $0x4] sm:$0xf] %vm834_vm2, %v1326_v39  ;;  %v1420_v20 = vsel %vm1096_vm3, %v1326_v39, 0  ;;  %2465 = vmatprep.subr.bf16.mxu1 %v2853_v0  ;;  %v1408_v42 = vpop.trf.xlu1  ;;  %v1470_v49 = vpop.trf.xlu0 }
 0x40c   : > { %2460 = vmatpush3.bf16.xpose.msra.mxu0 %v1420_v20  ;;  %v2635_v40 = vpop.eup %2634 }
 0x40d   : > { %2471 = vmatprep.subr.bf16.mxu0 %v2853_v0  ;;  %v1322_v41 = vmul.f32 %v2635_v40, %v3266_v16 }
 0x40f   : > { %v1327_v44 = vpack.c.bf16 %v1322_v41, %v1322_v41  ;;  %v1532_v50 = vpop.trf.xlu1 }
 0x410   : > { %v2637_v45 = vpop.eup %2636 }
 0x411   : > { %2456 = vmatmul.mubr.msk.bf16.vlgmr.msra.gmra.mrb[12].mxu1 %vm1096_vm3, %v1346_v25  ;;  %1332 = vst.msk [vmem:[%s3292_s29 + $0x8] sm:$0xf] %vm834_vm2, %v1327_v44  ;;  %v1482_v46 = vsel %vm1096_vm3, %v1327_v44, 0  ;;  %v1324_v47 = vmul.f32 %v2637_v45, %v3273_v58 }
 0x412   : > { %2467 = vmatprep.mubr.msk.bf16.mxu1 %vm2854_vm0, %v2853_v0  ;;  %2466 = vmatpush3.bf16.xpose.msra.mxu1 %v1482_v46 }
 0x413   : > { %2462 = vmatmul.mubr.msk.bf16.vlgmr.msra.gmra.mrb[16].mxu0 %vm1096_vm3, %v1408_v42  ;;  %v1328_v48 = vpack.c.bf16 %v1324_v47, %v1324_v47  ;;  %2477 = vmatprep.subr.bf16.mxu1 %v2853_v0 }
 0x414   : > { %2473 = vmatprep.mubr.msk.bf16.mxu0 %vm2854_vm0, %v2853_v0 }
 0x415   : > { %1333 = vst.msk [vmem:[%s3292_s29 + $0xc] sm:$0xf] %vm834_vm2, %v1328_v48  ;;  %v1544_v16 = vsel %vm1096_vm3, %v1328_v48, 0 }
 0x416   : > { %2472 = vmatpush3.bf16.xpose.msra.mxu0 %v1544_v16 }
 0x417   : > { %2485 = vmatprep.subr.bf16.mxu0 %v2853_v0 }
 0x419   : > { %2468 = vmatmul.mubr.msk.bf16.vlgmr.msra.gmra.mrb[16].mxu1 %vm1096_vm3, %v1470_v49 }
 0x41a   : > { %2481 = vmatprep.mubr.msk.bf16.mxu1 %vm2854_vm0, %v2853_v0  ;;  %2478 = vmatpush3.bf16.msra.mxu1 %v2614_v23 }
 0x41b   : > { %2479 = vmatprep.subr.bf16.mxu1 %v2853_v0 }
 0x41d   : > { %2474 = vmatmul.mubr.msk.bf16.vlgmr.msra.gmra.mrb[20].mxu0 %vm1096_vm3, %v1532_v50 }
 0x41e   : > { %2489 = vmatprep.mubr.msk.bf16.mxu0 %vm2854_vm0, %v2853_v0  ;;  %2480 = vmatpush3.bf16.msra.mxu1 %v2615_v34 }
 0x41f   : > { %2493 = vmatprep.subr.bf16.mxu1 %v2853_v0 }
 0x4e4   : > { %v1394_v51 = vpop.f32.mrb[12].mxu1 }
 0x4e5   : > { %v2457_v52 = vpop.f32.mrb[13].mxu1  ;;  %1586 = vxpose.xlu0.b32.start.end [1/1] (short) (narrow) %v1394_v51, 8 }
 0x4e6   : > { %v1397_v53 = vpop.f32.mrb[14].mxu1  ;;  %v1456_v54 = vpop.f32.mrb[16].mxu0 }
 0x4e7   : > { %v2458_v55 = vpop.f32.mrb[15].mxu1  ;;  %v2463_v56 = vpop.f32.mrb[17].mxu0  ;;  %1618 = vxpose.xlu1.b32.start.end [1/1] (short) (narrow) %v1456_v54, 8  ;;  %v1022_v54 = vunpack.c.l.bf16 %v3164_v6  ;;  %v2618_v6 = vld [vmem:[%s3483_s9] sm:$0xff]  }
 0x4e8   : > { %v1459_v57 = vpop.f32.mrb[18].mxu0 }
 0x4e9   : > { %v2464_v58 = vpop.f32.mrb[19].mxu0 }
 0x4ec   : > { %v1518_v59 = vpop.f32.mrb[16].mxu1 }
 0x4ed   : > { %1650 = vxpose.xlu0.b32.start.end [1/1] (short) (narrow) %v1518_v59, 8  ;;  %v2469_v60 = vpop.f32.mrb[17].mxu1 }
 0x4ee   : > { %v1521_v61 = vpop.f32.mrb[18].mxu1 }
 0x4ef   : > { %v2470_v62 = vpop.f32.mrb[19].mxu1 }
 0x4f0   : > { %v1580_v63 = vpop.f32.mrb[20].mxu0 }
 0x4f1   : > { %1682 = vxpose.xlu0.b32.start.end [1/1] (short) (narrow) %v1580_v63, 8  ;;  %v2475_v1 = vpop.f32.mrb[21].mxu0 }
 0x4f2   : > { %v1583_v2 = vpop.f32.mrb[22].mxu0 }
 0x4f3   : > { %v2476_v3 = vpop.f32.mrb[23].mxu0 }
 0x4f4   : > { %v2616_v3 = vld [vmem:[#allocation9] sm:$0xff]  }
 0x4f5   : > { %2486 = vmatpush3.bf16.msra.mxu0 %v2616_v3 }
 0x4f6   : > { %2487 = vmatprep.subr.bf16.mxu0 %v2853_v0 }
 0x565   : > { %v1602_v4 = vpop.trf.xlu0 }
 0x567   : > { %v1634_v7 = vpop.trf.xlu1 }
 0x56d   : > { %v1666_v5 = vpop.trf.xlu0 }
 0x56e   : > { %v1714_v8 = vcombine.low %v1602_v4, %v1666_v5  ;;  %v1715_v9 = vcombine.high %v1602_v4, %v1666_v5  ;;  %v2617_v4 = vld [vmem:[#allocation9 + $0x8] sm:$0xff]   ;;  %v2619_v5 = vld [vmem:[%s3483_s9 + $0x8] sm:$0xff]  }
 0x56f   : > { %2488 = vmatpush3.bf16.msra.mxu0 %v2617_v4 }
 0x570   : > { %v1722_v13 = vrot.slane %v1714_v8, %v3193_v28  ;;  %v1729_v14 = vrot.slane %v1715_v9, %v3193_v28 }
 0x571   : > { %v1698_v10 = vpop.trf.xlu0 }
 0x572   : > { %v1730_v11 = vcombine.low %v1634_v7, %v1698_v10  ;;  %v1731_v12 = vcombine.high %v1634_v7, %v1698_v10 }
 0x574   : > { %v1738_v15 = vrot.slane %v1730_v11, %v3193_v28  ;;  %v1745_v17 = vrot.slane %v1731_v12, %v3193_v28  ;;  %v2347_v11 = vld [vmem:[%s3479_s5] ss:$0 sm:$0xff] }
 0x576   : > { %v1746_v18 = vcombine.low %v1722_v13, %v1738_v15  ;;  %v1747_v19 = vcombine.high %v1722_v13, %v1738_v15  ;;  %v1762_v21 = vcombine.low %v1729_v14, %v1745_v17  ;;  %v1763_v22 = vcombine.high %v1729_v14, %v1745_v17  ;;  %v2348_v13 = vld [vmem:[%s3480_s6] ss:$0 sm:$0xff] }
 0x578   : > { %v1754_v43 = vrot.slane %v1746_v18, %v3196_v32  ;;  %v1761_v24 = vrot.slane %v1747_v19, %v3196_v32  ;;  %v1770_v26 = vrot.slane %v1762_v21, %v3196_v32  ;;  %v1777_v27 = vrot.slane %v1763_v22, %v3196_v32  ;;  %v2620_v18 = vld [vmem:[%s3483_s9 + $0x10] sm:$0xff]   ;;  %v2621_v19 = vld [vmem:[%s3483_s9 + $0x18] sm:$0xff]   ;;  %v2349_v21 = vld [vmem:[%s3521_s24] ss:$0 sm:$0xff]  ;;  %s2864_s24 = smov [#allocation11]  }
 0x579   : > { %s2732_s22 = sshll.u32 %s2864_s24, 4  ;;  %s2733_s22 = int_to_ptr.vmem [resolvable:$false] %s2732_s22 }
 0x57a   : > { %v1782_v29 = vcombine.low %v1754_v43, %v1761_v24  ;;  %v2342_v30 = vcombine.high %v1754_v43, %v1761_v24  ;;  %v1798_v31 = vcombine.low %v1770_v26, %v1777_v27  ;;  %v2343_v33 = vcombine.high %v1770_v26, %v1777_v27  ;;  %s2734_s29 = scalar_lea.vmem %s2733_s22, 512  ;;  %p2735_p3 = scmp.lt.s32.totalorder %s3387_s26, %s2733_s22 }
 0x57b   : > { %p2736_p5 = scmp.lt.s32.totalorder %s2734_s29, %s2728_s10 }
 0x57c   : > { %v1789_v35 = vrot.slane %v1782_v29, %v3193_v28  ;;  %v1797_v36 = vrot.slane %v2342_v30, %v3193_v28  ;;  %v1805_v37 = vrot.slane %v1798_v31, %v3193_v28  ;;  %v1813_v38 = vrot.slane %v2343_v33, %v3193_v28 }
 0x57d   : > { %p2737_p9 = por %p2736_p5, %p2735_p3 }
 0x57e   : > { %v1815_v39 = vcombine.high %v1789_v35, %v1797_v36  ;;  %v1831_v20 = vcombine.high %v1805_v37, %v1813_v38  ;;  %v1814_v40 = vcombine.low %v1789_v35, %v1797_v36  ;;  %v1830_v25 = vcombine.low %v1805_v37, %v1813_v38 }
 0x57f   : > { %p2738_p11 = pnand %p2737_p9, %p2731_p10 }
 0x580   : > { %v1829_v41 = vrot.slane %v1815_v39, %v3196_v32  ;;  %v1845_v42 = vrot.slane %v1831_v20, %v3196_v32  ;;  %v1822_v44 = vrot.slane %v1814_v40, %v3196_v32  ;;  %v1838_v45 = vrot.slane %v1830_v25, %v3196_v32 }
 0x582   : > { %v1848_v46 = vcombine.low %v1829_v41, %v1845_v42  ;;  %v1847_v47 = vcombine.high %v1822_v44, %v1838_v45  ;;  %v1846_v48 = vcombine.low %v1822_v44, %v1838_v45  ;;  %v1849_v28 = vcombine.high %v1829_v41, %v1845_v42 }
 0x584   : > { %1855 = vrot.lane.b32.xlu0 %v1848_v46, %s2861_s21  ;;  %1851 = vrot.lane.b32.xlu1 %v1847_v47, %s2862_s27  ;;  %s3524_s21 = sld [smem:[#allocation27_spill]] }
 0x588   : > { %1859 = vrot.lane.b32.xlu1 %v1849_v28, %s2863_s8  ;;  %s2146_s8 = scalar_lea.sflag [#allocation12], %s3128_s13 }
 0x58a   : > { %s3385_s27 = scalar_lea.hbm %s3524_s21, %s2368_s19 }
 0x5f6   : > { %v1852_v16 = vpop.permute.xlu1 %1851  ;;  %v1856_v49 = vpop.permute.xlu0 %1855 }
 0x5f7   : > { %v1862_v50 = vsel %vm1096_vm3, %v1846_v48, %v1852_v16 }
 0x5f8   : > { %v1864_v52 = vsel %vm1863_vm4, %v1862_v50, %v1856_v49 }
 0x5fa   : > { %v1860_v51 = vpop.permute.xlu1 %1859 }
 0x5fb   : > { %v1866_v53 = vsel %vm1865_vm5, %v1864_v52, %v1860_v51 }
 0x5fc   : > { %v1867_v32 = vpack.c.bf16 %v1866_v53, %v1866_v53 }
 0x5fe   : > { %2482 = vmatmul.mubr.msk.bf16.vlgmr.msra.gmra.mrb[20].mxu1 %vm561_vm1, %v1867_v32 }
 0x5ff   : > { %2501 = vmatprep.mubr.msk.bf16.mxu1 %vm2854_vm0, %v2853_v0  ;;  %2494 = vmatpush3.bf16.msra.mxu1 %v2618_v6 }
 0x600   : > { %2495 = vmatprep.subr.bf16.mxu1 %v2853_v0 }
 0x603   : > { %2496 = vmatpush3.bf16.msra.mxu1 %v2619_v5 }
 0x604   : > { %2497 = vmatprep.subr.bf16.mxu1 %v2853_v0 }
 0x607   : > { %2498 = vmatpush3.bf16.msra.mxu1 %v2620_v18 }
 0x608   : > { %2499 = vmatprep.subr.bf16.mxu1 %v2853_v0  ;;  %v2353_v0 = vld [vmem:[%s3522_s20] ss:$0 sm:$0xff] }
 0x60b   : > { %2500 = vmatpush3.bf16.msra.mxu1 %v2621_v19 }
 0x6d1   : > { %v1921_v55 = vpop.f32.mrb[20].mxu1 }
 0x6d2   : > { %v1922_v56 = vadd.f32 %v1921_v55, %v1022_v54  ;;  %v2483_v57 = vpop.f32.mrb[21].mxu1 }
 0x6d3   : > { %v1924_v58 = vpop.f32.mrb[22].mxu1 }
 0x6d4   : > { %v2484_v59 = vpop.f32.mrb[23].mxu1  ;;  %v1929_v60 = vsel %vm561_vm1, %v1922_v56, 0.0 }
 0x6d5   : > { %1930 = vadd.xlane.f32.xlu1 %v1929_v60 }
 0x762   : > { %v1931_v61 = vpop.xlane.xlu1 %1930 }
 0x763   : > { %v1933_v62 = vmul.f32 0.03125, %v1931_v61 }
 0x765   : > { %v1934_v63 = vsub.f32 %v1922_v56, %v1933_v62 }
 0x767   : > { %v1935_v1 = vmul.f32 %v1934_v63, %v1934_v63 }
 0x769   : > { %v1936_v2 = vsel %vm561_vm1, %v1935_v1, 0.0 }
 0x76a   : > { %1937 = vadd.xlane.f32.xlu0 %v1936_v2 }
 0x7f7   : > { %v1938_v7 = vpop.xlane.xlu0 %1937 }
 0x7f8   : > { %v1939_v8 = vmul.f32 0.03125, %v1938_v7 }
 0x7fa   : > { %v1940_v9 = vadd.f32 1e-06, %v1939_v8 }
 0x7fc   : > { %2638 = vrsqrt.f32 %v1940_v9 }
 0x806   : > { %v2639_v10 = vpop.eup %2638 }
 0x807   : > { %v1942_v12 = vmul.f32 %v2639_v10, %v1934_v63 }
 0x809   : > { %v1949_v14 = vmul.f32 %v2347_v11, %v1942_v12 }
 0x80b   : > { %v1956_v15 = vadd.f32 %v2348_v13, %v1949_v14 }
 0x80d   : > { %v1957_v17 = vpack.c.bf16 %v1956_v15, %v1956_v15 }
 0x80f   : > { %2490 = vmatmul.mubr.msk.bf16.vlgmr.msra.gmra.mrb[24].mxu0 %vm561_vm1, %v1957_v17 }
 0x8e2   : > { %v2018_v22 = vpop.f32.mrb[24].mxu0 }
 0x8e3   : > { %v2019_v23 = vadd.f32 %v2349_v21, %v2018_v22  ;;  %v2491_v43 = vpop.f32.mrb[25].mxu0 }
 0x8e4   : > { %v2021_v24 = vpop.f32.mrb[26].mxu0 }
 0x8e5   : > { %v2024_v26 = vmax.f32 %v2019_v23, 0.0  ;;  %v2492_v27 = vpop.f32.mrb[27].mxu0 }
 0x8e7   : > { %v2025_v29 = vpack.c.bf16 %v2024_v26, %v2024_v26 }
 0x8e9   : > { %2502 = vmatmul.mubr.msk.bf16.vlgmr.msra.gmra.mrb[24].mxu1 %vm2065_vm6, %v2025_v29 }
 0x9bc   : > { %v2103_v30 = vpop.f32.mrb[24].mxu1 }
 0x9bd   : > { %v2104_v31 = vadd.f32 %v2353_v0, %v2103_v30  ;;  %v2503_v33 = vpop.f32.mrb[25].mxu1 }
 0x9be   : > { %v2106_v34 = vpop.f32.mrb[26].mxu1 }
 0x9bf   : > { %v2504_v35 = vpop.f32.mrb[27].mxu1  ;;  %v2109_v36 = vadd.f32 %v2104_v31, %v1956_v15 }
 0x9c1   : > { %v2112_v37 = vsel %vm561_vm1, %v2109_v36, 0.0 }
 0x9c2   : > { %2113 = vadd.xlane.f32.xlu1 %v2112_v37 }
 0xa4f   : > { %v2114_v38 = vpop.xlane.xlu1 %2113 }
 0xa50   : > { %v2115_v39 = vmul.f32 0.03125, %v2114_v38 }
 0xa52   : > { %v2116_v20 = vsub.f32 %v2109_v36, %v2115_v39 }
 0xa54   : > { %v2117_v40 = vmul.f32 %v2116_v20, %v2116_v20 }
 0xa56   : > { %v2118_v25 = vsel %vm561_vm1, %v2117_v40, 0.0 }
 0xa57   : > { %2119 = vadd.xlane.f32.xlu0 %v2118_v25 }
 0xa58   : > { %2741 = shalt.err (!%p2738_p11)
}
 0xa59   : > { %s2742_s14 = scalar_lea.hbm %s3385_s27, 256  ;;  %s2746_s23 = scalar_lea.hbm %s3524_s21, 512 }
 0xa5a   : > { %p2743_p0 = scmp.ne.s32.totalorder %s3385_s27, %s2742_s14  ;;  %p2747_p6 = scmp.lt.u32.totalorder %s3385_s27, %s3524_s21 }
 0xa5b   : > { %p2748_p7 = scmp.lt.u32.totalorder %s2746_s23, %s2742_s14  ;;  %p2750_p8 = scmp.lt.u32.totalorder %s2742_s14, %s3385_s27 }
 0xa5c   : > { %p2744_p4 = pnand %p2743_p0, %p3525_p2 }
 0xa5d   : > { %p2749_p12 = por %p2748_p7, %p2747_p6 }
 0xa5e   : > { %p2745_p13 = pneg %p2744_p4 }
 0xa5f   : > { %p2751_p1 = por %p2750_p8, %p2749_p12 }
 0xa61   : > { %p2752_p10 = pnand %p2751_p1, %p2745_p13 }
 0xa63   : > { %2755 = shalt.err (!%p2752_p10)
}
 0xa64   : > { %s2865_s10 = smov 64   ;;  %s2866_s22 = smov 4  }
 0xa65   : > { %2516 = dma.vmem_to_hbm [thread:$0]  (%p3525_p2), %s3387_s26, 256, %s3385_s27, %s2146_s8, %s2865_s10, %s2865_s10, %s2866_s22  }
 0xa66   : > { %s2323_s29 = sshll.u32 %s3128_s13, 3  ;;  %s3526_s19 = sld [smem:[#allocation24_spill]] }
 0xa67   : > { %s3527_s24 = sld [smem:[#allocation25_spill]]  ;;  %s2363_s0 = sshll.u32 %s3523_s11, 7 }
 0xa68   : > { %s531_s1 = scalar_lea.vmem [#allocation10], %s2323_s29  ;;  %s3528_s10 = sld [smem:[#allocation26_spill]] }
 0xa69   : > { %s2160_s26 = sshll.u32 %s531_s1, 4  ;;  %s2141_s14 = scalar_lea.sflag [#allocation6], %s3128_s13  ;;  %s3426_s26 = int_to_ptr.vmem [resolvable:$true] %s2160_s26 }
 0xa6a   : > { %s2756_s20 = scalar_lea.vmem %s3426_s26, 128  ;;  %s2867_s11 = smov [#allocation10]  }
 0xa6b   : > { %p2757_p3 = scmp.ne.s32.totalorder %s3426_s26, %s2756_s20  ;;  %s2760_s29 = sshll.u32 %s2867_s11, 4  ;;  %s2761_s29 = int_to_ptr.vmem [resolvable:$false] %s2760_s29 }
 0xa6c   : > { %v2359_v46 = vld [vmem:[%s3526_s19] ss:$0 sm:$0xff]  ;;  %s2762_s19 = scalar_lea.vmem %s2761_s29, 256  ;;  %p2763_p11 = scmp.lt.s32.totalorder %s3426_s26, %s2761_s29 }
 0xa6d   : > { %v2360_v48 = vld [vmem:[%s3527_s24] ss:$0 sm:$0xff]  ;;  %p2758_p5 = pnand %p2757_p3, %p3525_p2  ;;  %p2764_p0 = scmp.lt.s32.totalorder %s2762_s19, %s2756_s20 }
 0xa6e   : > { %s3424_s22 = scalar_lea.hbm %s3528_s10, %s2363_s0 }
 0xa6f   : > { %p2759_p9 = pneg %p2758_p5  ;;  %p2765_p4 = por %p2764_p0, %p2763_p11 }
 0xa71   : > { %p2766_p13 = pnand %p2765_p4, %p2759_p9 }
 0xae4   : > { %v2120_v41 = vpop.xlane.xlu0 %2119 }
 0xae5   : > { %v2121_v42 = vmul.f32 0.03125, %v2120_v41 }
 0xae7   : > { %v2122_v44 = vadd.f32 1e-06, %v2121_v42 }
 0xae9   : > { %2640 = vrsqrt.f32 %v2122_v44 }
 0xaf3   : > { %v2641_v45 = vpop.eup %2640 }
 0xaf4   : > { %v2124_v47 = vmul.f32 %v2641_v45, %v2116_v20 }
 0xaf6   : > { %v2131_v28 = vmul.f32 %v2359_v46, %v2124_v47 }
 0xaf8   : > { %v2138_v16 = vadd.f32 %v2360_v48, %v2131_v28 }
 0xafa   : > { %2139 = vst.msk [vmem:[%s531_s1] sm:$0xff] %vm561_vm1, %v2138_v16 }
 0xafb   : > { %2769 = shalt.err (!%p2766_p13)
}
 0xafc   : > { %s2770_s0 = scalar_lea.hbm %s3424_s22, 128  ;;  %s2774_s23 = scalar_lea.hbm %s3528_s10, 256 }
 0xafd   : > { %p2771_p6 = scmp.ne.s32.totalorder %s3424_s22, %s2770_s0  ;;  %p2775_p8 = scmp.lt.u32.totalorder %s3424_s22, %s3528_s10 }
 0xafe   : > { %p2776_p1 = scmp.lt.u32.totalorder %s2774_s23, %s2770_s0  ;;  %p2778_p3 = scmp.lt.u32.totalorder %s2770_s0, %s3424_s22 }
 0xaff   : > { %p2772_p7 = pnand %p2771_p6, %p3525_p2 }
 0xb00   : > { %p2777_p10 = por %p2776_p1, %p2775_p8 }
 0xb01   : > { %p2773_p12 = pneg %p2772_p7 }
 0xb02   : > { %p2779_p5 = por %p2778_p3, %p2777_p10 }
 0xb04   : > { %p2780_p9 = pnand %p2779_p5, %p2773_p12 }
 0xb06   : > { %2783 = shalt.err (!%p2780_p9)
}
 0xb07   : > { %2515 = dma.vmem_to_hbm [thread:$0]  (%p3525_p2), %s3426_s26, 128, %s3424_s22, %s2141_s14  }
 0xb08 PF: > { %s3529_s27 = sld [smem:[#allocation17_spill]]  ;;  %s3530_s8 = sld [smem:[#allocation19_spill]] }
 0xb09   : > { %p3532_p0 = scmp.ge.s32.totalorder %s2846_s18, 2 }
 0xb0e   : > { %s2189_s20 = sand.u32 1, %s3529_s27   ;;  %p3531_p11 = scmp.ne.s32.totalorder %s3530_s8, 0 }
 0xb0f   : > { %s2190_s11 = scalar_lea.sflag [#allocation6], %s2189_s20 }
 0xb10   : > { %p2531_p4 = pnand %p3532_p0, %p3531_p11 }
 0xb12   : > { %2817 = dma.done.wait (!%p2531_p4), %s2190_s11, 128  }
 0xb13   : > { %2819 = vsyncadd (!%p2531_p4), %s2190_s11, 4294967168  ;;  %s2199_s29 = scalar_lea.sflag [#allocation12], %s2189_s20 }
 0xb14   : > { %2821 = dma.done.wait (!%p2531_p4), %s2199_s29, 256  }
 0xb15   : > { %2823 = vsyncadd (!%p2531_p4), %s2199_s29, 4294967040  ;;  %s35_s18 = sadd.s32 1, %s2846_s18   ;;  %s3533_s28 = smov %s3540_s16 }
 0xb16   : > { %p32_p13 = scmp.ge.s32.totalorder %s35_s18, 4   ;;  %s3534_s29 = smov %s2830_s30 }
 0xb17   : > { %s3535_s30 = smov %s2834_s15  ;;  %s3536_s15 = smov %s3085_s12 }
 0xb18   : > { %s3537_s16 = smov %s2842_s17  ;;  %s3538_s17 = smov %s3533_s28 }
 0xb19   :  { %34 = sbr.rel (!%p32_p13) target bundleno = 18 (0x12), region = 147 }
 0xb20   :  { %2204 = vsyncpa [#allocation5], 1 }
 0xb21   :  { %2206 = vsyncpa [#allocation5 + $0x1], 1 }
 0xb22   :  { %2207 = vsyncpa [#allocation8], 1 }
 0xb23   :  { %2208 = vsyncpa [#allocation6], 1 }
 0xb24   :  { %2210 = vsyncpa [#allocation6 + $0x1], 1 }
 0xb25   :  { %2211 = vsyncpa [#allocation12], 1 }
 0xb26   :  { %2213 = vsyncpa [#allocation12 + $0x1], 1 }

</bundles_post_ra>
